<compile_context>
chip_gen: v7x
topology: tpu7x:2x2x1
jax: 0.10.0
libtpu: 0.0.40
codegen_flags: <defaults>
</compile_context>

<pallas_src>
import jax
import jax.numpy as jnp
from jax.experimental import pallas as pl
from jax.experimental.pallas import tpu as pltpu


def _round_up(x, m):
    return ((x + m - 1) // m) * m


def conv_bn_relu(x, w, gamma, beta, running_mean, running_var, *,
                 stride=1, pad=1, dilation=1, eps=1e-5,
                 compute_dtype=None, target_rows_per_tile=1024):
    """Fused Conv2d(bias=False) + BatchNorm2d(eval) + ReLU.  x: NCHW, w: OIHW."""
    N, C_in, H, W = x.shape
    C_out, C_in_w, KH, KW = w.shape
    assert C_in == C_in_w
    if compute_dtype is None:
        compute_dtype = x.dtype
    out_dtype = x.dtype

    H_out = (H + 2 * pad - dilation * (KH - 1) - 1) // stride + 1
    W_out = (W + 2 * pad - dilation * (KW - 1) - 1) // stride + 1
    H_pad, W_pad = H + 2 * pad, W + 2 * pad

    LANE, SUBLANE = 128, 8
    C_in_p = _round_up(C_in, SUBLANE)     # sublane-aligned contraction dim
    C_out_p = _round_up(C_out, LANE)      # lane-dense output channels

    # ---- x: NCHW -> NHWC, spatial zero-pad, channel zero-pad, compute dtype.
    # One XLA pass over x; replaces the 9x-duplicated HBM im2col of v1.
    x_nhwc = jnp.transpose(x, (0, 2, 3, 1))
    x_p = jnp.pad(x_nhwc, ((0, 0), (pad, pad), (pad, pad), (0, C_in_p - C_in)))
    x_p = x_p.astype(compute_dtype)

    # ---- weights: OIHW -> (KH*KW, C_in_p, C_out_p), unscaled (BN in epilogue).
    w_t = jnp.transpose(w, (2, 3, 1, 0)).reshape(KH * KW, C_in, C_out)
    w_mat = jnp.pad(w_t, ((0, 0), (0, C_in_p - C_in), (0, C_out_p - C_out)))
    w_mat = w_mat.astype(compute_dtype)

    # ---- BatchNorm (running stats) as per-channel f32 scale + bias.
    scale = (gamma.astype(jnp.float32)
             / jnp.sqrt(running_var.astype(jnp.float32) + eps))
    bias = beta.astype(jnp.float32) - running_mean.astype(jnp.float32) * scale
    scale_mat = jnp.pad(scale, (0, C_out_p - C_out)).reshape(1, C_out_p)
    bias_mat = jnp.pad(bias, (0, C_out_p - C_out)).reshape(1, C_out_p)

    # ---- Tile H_out with a divisor (no ragged blocks, no in-kernel OOB reads).
    th = 1
    for cand in range(1, H_out + 1):
        if H_out % cand == 0 and cand * W_out <= target_rows_per_tile:
            th = cand
    # Ensure >=2 grid steps when possible so both v7x TensorCores get work.
    if N * (H_out // th) < 2:
        for cand in range(H_out // 2, 0, -1):
            if H_out % cand == 0:
                th = cand
                break
    n_h = H_out // th

    def kernel(x_ref, w_ref, s_ref, b_ref, o_ref):
        ht = pl.program_id(1)
        row0 = ht * (th * stride)              # first input row for this tile
        acc = jnp.zeros((th * W_out, C_out_p), jnp.float32)
        for kh in range(KH):
            for kw in range(KW):
                h0 = row0 + kh * dilation
                w0 = kw * dilation
                if stride == 1:
                    xs = x_ref[0, pl.ds(h0, th), pl.ds(w0, W_out), :]
                else:
                    # TODO(synk): strided VMEM slices (stride>1) are a less
                    # exercised Mosaic path; this script validates stride==1.
                    xs = x_ref[0, pl.ds(h0, th, stride),
                               pl.ds(w0, W_out, stride), :]
                xs2d = xs.reshape(th * W_out, C_in_p)
                w_tap = w_ref[kh * KW + kw]                 # (C_in_p, C_out_p)
                acc = acc + jnp.dot(xs2d, w_tap,
                                    preferred_element_type=jnp.float32)
        # Fused BN (f32 per-channel scale/bias on the f32 accumulator) + ReLU.
        y = jnp.maximum(acc * s_ref[...] + b_ref[...], 0.0)
        o_ref[...] = y.reshape(1, th, W_out, C_out_p).astype(o_ref.dtype)

    itemsize = jnp.dtype(compute_dtype).itemsize
    cost = pl.CostEstimate(
        flops=2 * N * H_out * W_out * C_out * C_in * KH * KW,
        transcendentals=0,
        bytes_accessed=(N * H_pad * W_pad * C_in_p * itemsize
                        + KH * KW * C_in_p * C_out_p * itemsize
                        + N * H_out * W_out * C_out_p
                        * jnp.dtype(out_dtype).itemsize),
    )

    out_nhwc = pl.pallas_call(
        kernel,
        out_shape=jax.ShapeDtypeStruct((N, H_out, W_out, C_out_p), out_dtype),
        grid_spec=pltpu.PrefetchScalarGridSpec(
            num_scalar_prefetch=0,
            grid=(N, n_h),
            in_specs=[
                # Full padded image per batch element; resident across the
                # h-tile axis (index_map ignores h, so no re-fetch per tile).
                pl.BlockSpec((1, H_pad, W_pad, C_in_p),
                             lambda n, h: (n, 0, 0, 0)),
                pl.BlockSpec((KH * KW, C_in_p, C_out_p),
                             lambda n, h: (0, 0, 0)),
                pl.BlockSpec((1, C_out_p), lambda n, h: (0, 0)),
                pl.BlockSpec((1, C_out_p), lambda n, h: (0, 0)),
            ],
            out_specs=pl.BlockSpec((1, th, W_out, C_out_p),
                                   lambda n, h: (n, h, 0, 0)),
        ),
        compiler_params=pltpu.CompilerParams(
            dimension_semantics=("parallel", "parallel"),
            # <= 48 MiB so the same tiling is safe on v7x's 64 MiB VMEM.
            vmem_limit_bytes=48 * 1024 * 1024,
        ),
        cost_estimate=cost,
    )(x_p, w_mat, scale_mat, bias_mat)

    # Slice off the lane padding and return NCHW to match PyTorch semantics.
    # TODO(synk): if the consumer accepts channels-last, skip this transpose.
    out = out_nhwc[..., :C_out].transpose(0, 3, 1, 2)
    return out


if __name__ == "__main__":
    key = jax.random.PRNGKey(0)
    k1, k2, k3, k4, k5, k6 = jax.random.split(key, 6)

    N, C_in, H, W = 2, 4, 16, 16
    C_out, KH, KW = 8, 3, 3

    x = jax.random.normal(k1, (N, C_in, H, W), dtype=jnp.float32)
    w = jax.random.normal(k2, (C_out, C_in, KH, KW), dtype=jnp.float32) * 0.1
    gamma = jax.random.uniform(k3, (C_out,), minval=0.5, maxval=1.5)
    beta = jax.random.normal(k4, (C_out,)) * 0.1
    running_mean = jax.random.normal(k5, (C_out,)) * 0.1
    running_var = jax.random.uniform(k6, (C_out,), minval=0.5, maxval=1.5)

    y = conv_bn_relu(x, w, gamma, beta, running_mean, running_var)
    jax.block_until_ready(y)

    # Pure-JAX reference: conv -> BN (running stats) -> ReLU.
    conv = jax.lax.conv_general_dilated(
        x, w, window_strides=(1, 1), padding=[(1, 1), (1, 1)],
        rhs_dilation=(1, 1), dimension_numbers=("NCHW", "OIHW", "NCHW"))
    eps = 1e-5
    scale = gamma / jnp.sqrt(running_var + eps)
    bias = beta - running_mean * scale
    ref = jnp.maximum(
        conv * scale[None, :, None, None] + bias[None, :, None, None], 0.0)

    assert y.shape == ref.shape == (N, C_out, H, W)
    assert y.dtype == x.dtype
    err = float(jnp.max(jnp.abs(y - ref)))
    assert jnp.allclose(y, ref, atol=1e-4, rtol=1e-4), err

    # bf16-compute path (MXU-native inputs, f32 accumulation) — looser tol.
    y_bf16 = conv_bn_relu(x, w, gamma, beta, running_mean, running_var,
                          compute_dtype=jnp.bfloat16)
    jax.block_until_ready(y_bf16)
    err_bf16 = float(jnp.max(jnp.abs(y_bf16 - ref)))
    assert jnp.allclose(y_bf16, ref, atol=1e-1, rtol=1e-1), err_bf16

    print("KERNEL_OK")
</pallas_src>

<mosaic_0001>
module attributes {stable_mosaic.version = 11 : i64} {
  func.func @kernel(%arg0: i32, %arg1: i32, %arg2: memref<1x18x18x8xf32, #tpu.memory_space<vmem>>, %arg3: memref<9x8x128xf32, #tpu.memory_space<vmem>>, %arg4: memref<1x128xf32, #tpu.memory_space<vmem>>, %arg5: memref<1x128xf32, #tpu.memory_space<vmem>>, %arg6: memref<1x16x16x128xf32, #tpu.memory_space<vmem>>) attributes {dimension_semantics = [#tpu.dimension_semantics<parallel>, #tpu.dimension_semantics<parallel>], iteration_bounds = array<i64: 2, 1>, scalar_prefetch = 0 : i64, scratch_operands = 0 : i64, tpu.core_type = #tpu.core_type<tc>, window_params = [{transform_indices = @transform_0, window_bounds = array<i64: 1, 18, 18, 8>}, {pipeline_mode = #tpu.pipeline_mode<synchronous>, transform_indices = @transform_1, window_bounds = array<i64: 9, 8, 128>}, {pipeline_mode = #tpu.pipeline_mode<synchronous>, transform_indices = @transform_2, window_bounds = array<i64: 1, 128>}, {pipeline_mode = #tpu.pipeline_mode<synchronous>, transform_indices = @transform_3, window_bounds = array<i64: 1, 128>}, {transform_indices = @transform_4, window_bounds = array<i64: 1, 16, 16, 128>}]} {
    %c16_i32 = arith.constant 16 : i32
    %0 = arith.muli %arg1, %c16_i32 : i32
    %cst = arith.constant 0.000000e+00 : f32
    %1 = vector.broadcast %cst : f32 to vector<256x128xf32>
    %c0_i32 = arith.constant 0 : i32
    %2 = arith.addi %0, %c0_i32 : i32
    %c0 = arith.constant 0 : index
    %3 = arith.index_cast %2 : i32 to index
    %c0_0 = arith.constant 0 : index
    %c0_1 = arith.constant 0 : index
    %4 = vector.load %arg2[%c0, %3, %c0_0, %c0_1] : memref<1x18x18x8xf32, #tpu.memory_space<vmem>>, vector<1x16x16x8xf32>
    %5 = vector.shape_cast %4 : vector<1x16x16x8xf32> to vector<16x16x8xf32>
    %6 = vector.shape_cast %5 : vector<16x16x8xf32> to vector<256x8xf32>
    %c0_2 = arith.constant 0 : index
    %c0_3 = arith.constant 0 : index
    %c0_4 = arith.constant 0 : index
    %7 = vector.load %arg3[%c0_2, %c0_3, %c0_4] : memref<9x8x128xf32, #tpu.memory_space<vmem>>, vector<1x8x128xf32>
    %8 = vector.shape_cast %7 : vector<1x8x128xf32> to vector<8x128xf32>
    %cst_5 = arith.constant dense<0.000000e+00> : vector<256x128xf32>
    %9 = tpu.matmul %6, %8, %cst_5 {dimension_numbers = #tpu.dot_dimension_numbers<[1], [0], [0], [1], [0, 0, 1, 1], [], []>} : vector<256x8xf32>, vector<8x128xf32>, vector<256x128xf32> -> vector<256x128xf32>
    %10 = arith.addf %1, %9 : vector<256x128xf32>
    %c0_i32_6 = arith.constant 0 : i32
    %11 = arith.addi %0, %c0_i32_6 : i32
    %c0_7 = arith.constant 0 : index
    %12 = arith.index_cast %11 : i32 to index
    %c1 = arith.constant 1 : index
    %c0_8 = arith.constant 0 : index
    %13 = vector.load %arg2[%c0_7, %12, %c1, %c0_8] : memref<1x18x18x8xf32, #tpu.memory_space<vmem>>, vector<1x16x16x8xf32>
    %14 = vector.shape_cast %13 : vector<1x16x16x8xf32> to vector<16x16x8xf32>
    %15 = vector.shape_cast %14 : vector<16x16x8xf32> to vector<256x8xf32>
    %c1_9 = arith.constant 1 : index
    %c0_10 = arith.constant 0 : index
    %c0_11 = arith.constant 0 : index
    %16 = vector.load %arg3[%c1_9, %c0_10, %c0_11] : memref<9x8x128xf32, #tpu.memory_space<vmem>>, vector<1x8x128xf32>
    %17 = vector.shape_cast %16 : vector<1x8x128xf32> to vector<8x128xf32>
    %cst_12 = arith.constant dense<0.000000e+00> : vector<256x128xf32>
    %18 = tpu.matmul %15, %17, %cst_12 {dimension_numbers = #tpu.dot_dimension_numbers<[1], [0], [0], [1], [0, 0, 1, 1], [], []>} : vector<256x8xf32>, vector<8x128xf32>, vector<256x128xf32> -> vector<256x128xf32>
    %19 = arith.addf %10, %18 : vector<256x128xf32>
    %c0_i32_13 = arith.constant 0 : i32
    %20 = arith.addi %0, %c0_i32_13 : i32
    %c0_14 = arith.constant 0 : index
    %21 = arith.index_cast %20 : i32 to index
    %c2 = arith.constant 2 : index
    %c0_15 = arith.constant 0 : index
    %22 = vector.load %arg2[%c0_14, %21, %c2, %c0_15] : memref<1x18x18x8xf32, #tpu.memory_space<vmem>>, vector<1x16x16x8xf32>
    %23 = vector.shape_cast %22 : vector<1x16x16x8xf32> to vector<16x16x8xf32>
    %24 = vector.shape_cast %23 : vector<16x16x8xf32> to vector<256x8xf32>
    %c2_16 = arith.constant 2 : index
    %c0_17 = arith.constant 0 : index
    %c0_18 = arith.constant 0 : index
    %25 = vector.load %arg3[%c2_16, %c0_17, %c0_18] : memref<9x8x128xf32, #tpu.memory_space<vmem>>, vector<1x8x128xf32>
    %26 = vector.shape_cast %25 : vector<1x8x128xf32> to vector<8x128xf32>
    %cst_19 = arith.constant dense<0.000000e+00> : vector<256x128xf32>
    %27 = tpu.matmul %24, %26, %cst_19 {dimension_numbers = #tpu.dot_dimension_numbers<[1], [0], [0], [1], [0, 0, 1, 1], [], []>} : vector<256x8xf32>, vector<8x128xf32>, vector<256x128xf32> -> vector<256x128xf32>
    %28 = arith.addf %19, %27 : vector<256x128xf32>
    %c1_i32 = arith.constant 1 : i32
    %29 = arith.addi %0, %c1_i32 : i32
    %c0_20 = arith.constant 0 : index
    %30 = arith.index_cast %29 : i32 to index
    %c0_21 = arith.constant 0 : index
    %c0_22 = arith.constant 0 : index
    %31 = vector.load %arg2[%c0_20, %30, %c0_21, %c0_22] : memref<1x18x18x8xf32, #tpu.memory_space<vmem>>, vector<1x16x16x8xf32>
    %32 = vector.shape_cast %31 : vector<1x16x16x8xf32> to vector<16x16x8xf32>
    %33 = vector.shape_cast %32 : vector<16x16x8xf32> to vector<256x8xf32>
    %c3 = arith.constant 3 : index
    %c0_23 = arith.constant 0 : index
    %c0_24 = arith.constant 0 : index
    %34 = vector.load %arg3[%c3, %c0_23, %c0_24] : memref<9x8x128xf32, #tpu.memory_space<vmem>>, vector<1x8x128xf32>
    %35 = vector.shape_cast %34 : vector<1x8x128xf32> to vector<8x128xf32>
    %cst_25 = arith.constant dense<0.000000e+00> : vector<256x128xf32>
    %36 = tpu.matmul %33, %35, %cst_25 {dimension_numbers = #tpu.dot_dimension_numbers<[1], [0], [0], [1], [0, 0, 1, 1], [], []>} : vector<256x8xf32>, vector<8x128xf32>, vector<256x128xf32> -> vector<256x128xf32>
    %37 = arith.addf %28, %36 : vector<256x128xf32>
    %c1_i32_26 = arith.constant 1 : i32
    %38 = arith.addi %0, %c1_i32_26 : i32
    %c0_27 = arith.constant 0 : index
    %39 = arith.index_cast %38 : i32 to index
    %c1_28 = arith.constant 1 : index
    %c0_29 = arith.constant 0 : index
    %40 = vector.load %arg2[%c0_27, %39, %c1_28, %c0_29] : memref<1x18x18x8xf32, #tpu.memory_space<vmem>>, vector<1x16x16x8xf32>
    %41 = vector.shape_cast %40 : vector<1x16x16x8xf32> to vector<16x16x8xf32>
    %42 = vector.shape_cast %41 : vector<16x16x8xf32> to vector<256x8xf32>
    %c4 = arith.constant 4 : index
    %c0_30 = arith.constant 0 : index
    %c0_31 = arith.constant 0 : index
    %43 = vector.load %arg3[%c4, %c0_30, %c0_31] : memref<9x8x128xf32, #tpu.memory_space<vmem>>, vector<1x8x128xf32>
    %44 = vector.shape_cast %43 : vector<1x8x128xf32> to vector<8x128xf32>
    %cst_32 = arith.constant dense<0.000000e+00> : vector<256x128xf32>
    %45 = tpu.matmul %42, %44, %cst_32 {dimension_numbers = #tpu.dot_dimension_numbers<[1], [0], [0], [1], [0, 0, 1, 1], [], []>} : vector<256x8xf32>, vector<8x128xf32>, vector<256x128xf32> -> vector<256x128xf32>
    %46 = arith.addf %37, %45 : vector<256x128xf32>
    %c1_i32_33 = arith.constant 1 : i32
    %47 = arith.addi %0, %c1_i32_33 : i32
    %c0_34 = arith.constant 0 : index
    %48 = arith.index_cast %47 : i32 to index
    %c2_35 = arith.constant 2 : index
    %c0_36 = arith.constant 0 : index
    %49 = vector.load %arg2[%c0_34, %48, %c2_35, %c0_36] : memref<1x18x18x8xf32, #tpu.memory_space<vmem>>, vector<1x16x16x8xf32>
    %50 = vector.shape_cast %49 : vector<1x16x16x8xf32> to vector<16x16x8xf32>
    %51 = vector.shape_cast %50 : vector<16x16x8xf32> to vector<256x8xf32>
    %c5 = arith.constant 5 : index
    %c0_37 = arith.constant 0 : index
    %c0_38 = arith.constant 0 : index
    %52 = vector.load %arg3[%c5, %c0_37, %c0_38] : memref<9x8x128xf32, #tpu.memory_space<vmem>>, vector<1x8x128xf32>
    %53 = vector.shape_cast %52 : vector<1x8x128xf32> to vector<8x128xf32>
    %cst_39 = arith.constant dense<0.000000e+00> : vector<256x128xf32>
    %54 = tpu.matmul %51, %53, %cst_39 {dimension_numbers = #tpu.dot_dimension_numbers<[1], [0], [0], [1], [0, 0, 1, 1], [], []>} : vector<256x8xf32>, vector<8x128xf32>, vector<256x128xf32> -> vector<256x128xf32>
    %55 = arith.addf %46, %54 : vector<256x128xf32>
    %c2_i32 = arith.constant 2 : i32
    %56 = arith.addi %0, %c2_i32 : i32
    %c0_40 = arith.constant 0 : index
    %57 = arith.index_cast %56 : i32 to index
    %c0_41 = arith.constant 0 : index
    %c0_42 = arith.constant 0 : index
    %58 = vector.load %arg2[%c0_40, %57, %c0_41, %c0_42] : memref<1x18x18x8xf32, #tpu.memory_space<vmem>>, vector<1x16x16x8xf32>
    %59 = vector.shape_cast %58 : vector<1x16x16x8xf32> to vector<16x16x8xf32>
    %60 = vector.shape_cast %59 : vector<16x16x8xf32> to vector<256x8xf32>
    %c6 = arith.constant 6 : index
    %c0_43 = arith.constant 0 : index
    %c0_44 = arith.constant 0 : index
    %61 = vector.load %arg3[%c6, %c0_43, %c0_44] : memref<9x8x128xf32, #tpu.memory_space<vmem>>, vector<1x8x128xf32>
    %62 = vector.shape_cast %61 : vector<1x8x128xf32> to vector<8x128xf32>
    %cst_45 = arith.constant dense<0.000000e+00> : vector<256x128xf32>
    %63 = tpu.matmul %60, %62, %cst_45 {dimension_numbers = #tpu.dot_dimension_numbers<[1], [0], [0], [1], [0, 0, 1, 1], [], []>} : vector<256x8xf32>, vector<8x128xf32>, vector<256x128xf32> -> vector<256x128xf32>
    %64 = arith.addf %55, %63 : vector<256x128xf32>
    %c2_i32_46 = arith.constant 2 : i32
    %65 = arith.addi %0, %c2_i32_46 : i32
    %c0_47 = arith.constant 0 : index
    %66 = arith.index_cast %65 : i32 to index
    %c1_48 = arith.constant 1 : index
    %c0_49 = arith.constant 0 : index
    %67 = vector.load %arg2[%c0_47, %66, %c1_48, %c0_49] : memref<1x18x18x8xf32, #tpu.memory_space<vmem>>, vector<1x16x16x8xf32>
    %68 = vector.shape_cast %67 : vector<1x16x16x8xf32> to vector<16x16x8xf32>
    %69 = vector.shape_cast %68 : vector<16x16x8xf32> to vector<256x8xf32>
    %c7 = arith.constant 7 : index
    %c0_50 = arith.constant 0 : index
    %c0_51 = arith.constant 0 : index
    %70 = vector.load %arg3[%c7, %c0_50, %c0_51] : memref<9x8x128xf32, #tpu.memory_space<vmem>>, vector<1x8x128xf32>
    %71 = vector.shape_cast %70 : vector<1x8x128xf32> to vector<8x128xf32>
    %cst_52 = arith.constant dense<0.000000e+00> : vector<256x128xf32>
    %72 = tpu.matmul %69, %71, %cst_52 {dimension_numbers = #tpu.dot_dimension_numbers<[1], [0], [0], [1], [0, 0, 1, 1], [], []>} : vector<256x8xf32>, vector<8x128xf32>, vector<256x128xf32> -> vector<256x128xf32>
    %73 = arith.addf %64, %72 : vector<256x128xf32>
    %c2_i32_53 = arith.constant 2 : i32
    %74 = arith.addi %0, %c2_i32_53 : i32
    %c0_54 = arith.constant 0 : index
    %75 = arith.index_cast %74 : i32 to index
    %c2_55 = arith.constant 2 : index
    %c0_56 = arith.constant 0 : index
    %76 = vector.load %arg2[%c0_54, %75, %c2_55, %c0_56] : memref<1x18x18x8xf32, #tpu.memory_space<vmem>>, vector<1x16x16x8xf32>
    %77 = vector.shape_cast %76 : vector<1x16x16x8xf32> to vector<16x16x8xf32>
    %78 = vector.shape_cast %77 : vector<16x16x8xf32> to vector<256x8xf32>
    %c8 = arith.constant 8 : index
    %c0_57 = arith.constant 0 : index
    %c0_58 = arith.constant 0 : index
    %79 = vector.load %arg3[%c8, %c0_57, %c0_58] : memref<9x8x128xf32, #tpu.memory_space<vmem>>, vector<1x8x128xf32>
    %80 = vector.shape_cast %79 : vector<1x8x128xf32> to vector<8x128xf32>
    %cst_59 = arith.constant dense<0.000000e+00> : vector<256x128xf32>
    %81 = tpu.matmul %78, %80, %cst_59 {dimension_numbers = #tpu.dot_dimension_numbers<[1], [0], [0], [1], [0, 0, 1, 1], [], []>} : vector<256x8xf32>, vector<8x128xf32>, vector<256x128xf32> -> vector<256x128xf32>
    %82 = arith.addf %73, %81 : vector<256x128xf32>
    %c0_60 = arith.constant 0 : index
    %c0_61 = arith.constant 0 : index
    %83 = vector.load %arg4[%c0_60, %c0_61] : memref<1x128xf32, #tpu.memory_space<vmem>>, vector<1x128xf32>
    %84 = vector.broadcast %83 : vector<1x128xf32> to vector<256x128xf32>
    %85 = arith.mulf %82, %84 : vector<256x128xf32>
    %c0_62 = arith.constant 0 : index
    %c0_63 = arith.constant 0 : index
    %86 = vector.load %arg5[%c0_62, %c0_63] : memref<1x128xf32, #tpu.memory_space<vmem>>, vector<1x128xf32>
    %87 = vector.broadcast %86 : vector<1x128xf32> to vector<256x128xf32>
    %88 = arith.addf %85, %87 : vector<256x128xf32>
    %cst_64 = arith.constant 0.000000e+00 : f32
    %89 = vector.broadcast %cst_64 : f32 to vector<256x128xf32>
    %90 = arith.maximumf %88, %89 : vector<256x128xf32>
    %91 = vector.shape_cast %90 : vector<256x128xf32> to vector<1x16x16x128xf32>
    %c0_65 = arith.constant 0 : index
    %c0_66 = arith.constant 0 : index
    %c0_67 = arith.constant 0 : index
    %c0_68 = arith.constant 0 : index
    %92 = vector.load %arg6[%c0_65, %c0_66, %c0_67, %c0_68] : memref<1x16x16x128xf32, #tpu.memory_space<vmem>>, vector<1x16x16x128xf32>
    tpu.vector_store %arg6[%c0_65, %c0_66, %c0_67, %c0_68], %91 {strides = array<i32>} : memref<1x16x16x128xf32, #tpu.memory_space<vmem>>, vector<1x16x16x128xf32>,
    return
  }
  func.func @transform_0(%arg0: i32, %arg1: i32) -> (i32, i32, i32, i32) {
    %c0_i32 = arith.constant 0 : i32
    %c0_i32_0 = arith.constant 0 : i32
    %c0_i32_1 = arith.constant 0 : i32
    %c0_i32_2 = arith.constant 0 : i32
    return %arg0, %c0_i32, %c0_i32_0, %c0_i32_1 : i32, i32, i32, i32
  }
  func.func @transform_1(%arg0: i32, %arg1: i32) -> (i32, i32, i32) {
    %c0_i32 = arith.constant 0 : i32
    %c0_i32_0 = arith.constant 0 : i32
    %c0_i32_1 = arith.constant 0 : i32
    %c0_i32_2 = arith.constant 0 : i32
    return %c0_i32, %c0_i32_0, %c0_i32_1 : i32, i32, i32
  }
  func.func @transform_2(%arg0: i32, %arg1: i32) -> (i32, i32) {
    %c0_i32 = arith.constant 0 : i32
    %c0_i32_0 = arith.constant 0 : i32
    %c0_i32_1 = arith.constant 0 : i32
    return %c0_i32, %c0_i32_0 : i32, i32
  }
  func.func @transform_3(%arg0: i32, %arg1: i32) -> (i32, i32) {
    %c0_i32 = arith.constant 0 : i32
    %c0_i32_0 = arith.constant 0 : i32
    %c0_i32_1 = arith.constant 0 : i32
    return %c0_i32, %c0_i32_0 : i32, i32
  }
  func.func @transform_4(%arg0: i32, %arg1: i32) -> (i32, i32, i32, i32) {
    %c0_i32 = arith.constant 0 : i32
    %c0_i32_0 = arith.constant 0 : i32
    %c0_i32_1 = arith.constant 0 : i32
    return %arg0, %arg1, %c0_i32, %c0_i32_0 : i32, i32, i32, i32
  }
}

</mosaic_0001>

<bundles_post_ra>
// kernel: tpu_custom_call.1
= control target key start
LH: loop header
LB: loop body
LE: loop exit
PB: predicated region body
PF: predicated region fallthrough
CT: control target
= control target key end

     0   :  { %9 = vsyncpa [#allocation3], 0  ;;  %s6708_s0 = inlined_call_operand.vmem [shape: f32[2,18,18,8], index: 0, kind: input, shape index: {}]   ;;  %s6709_s1 = inlined_call_operand.vmem [shape: f32[9,8,128], index: 1, kind: input, shape index: {}]   ;;  %s6710_s2 = inlined_call_operand.vmem [shape: f32[1,128], index: 2, kind: input, shape index: {}]   ;;  %s6711_s3 = inlined_call_operand.vmem [shape: f32[1,128], index: 3, kind: input, shape index: {}]   ;;  %s6712_s4 = inlined_call_operand.hbm [shape: f32[2,16,16,128], index: 4, kind: output, shape index: {}]  }
   0x1   :  { %11 = vsyncpa [#allocation3 + $0x1], 0  ;;  %s5555_s15 = smov 0   ;;  %s5557_s16 = smov 0  }
   0x2   :  { %s5559_s17 = smov 0   ;;  %s5561_s18 = smov 0  }
   0x3   :  { %s5563_s19 = smov 0   ;;  %s5565_s20 = smov 0  }
   0x4 LB: > { %s3881_s21 = sadd.s32 4294967295, %s5525_s20   ;;  %s3882_s22 = sadd.s32 4294967294, %s5525_s20   ;;  %s5525_s20 = sphi %s5565_s20, %s17_s20   ;;  %s5521_s19 = sphi %s5563_s19, %s6828_s19   ;;  %s5517_s18 = sphi %s5561_s18, %s6827_s18   ;;  %s5513_s17 = sphi %s5559_s17, %s6826_s17   ;;  %s5509_s16 = sphi %s5557_s16, %s6825_s16   ;;  %s5505_s15 = sphi %s5555_s15, %s6824_s15  }
   0x5   : > { %s29_s23 = sadd.s32 1, %s5521_s19  ;;  %s127_s24 = sadd.s32 1, %s5513_s17 }
   0x6   : > { %p31_p0 = scmp.ge.s32.totalorder %s29_s23, 2  ;;  %p137_p1 = scmp.ne.s32.totalorder %s5513_s17, %s5509_s16 }
   0x7   : > { %p138_p2 = scmp.eq.s32.totalorder %s3881_s21, 1  ;;  %p143_p3 = scmp.ne.s32.totalorder %s5509_s16, %s5505_s15 }
   0x8   : > { %s6830_s23 = smov (%p31_p0, %s29_s23), 0  ;;  %p144_p5 = scmp.eq.s32.totalorder %s3882_s22, 1 }
   0x9   : > { %p5595_p4 = por %p138_p2, %p137_p1  ;;  %s122_s26 = ssub.s32 %s5521_s19, %s6830_s23 }
   0xa   : > { %p3885_p6 = scmp.ge.s32.totalorder %s5525_s20, 1  ;;  %p125_p7 = scmp.eq.s32.totalorder %s122_s26, 0 }
   0xb   : > { %p5602_p8 = por %p144_p5, %p143_p3  ;;  %p179_p9 = scmp.lt.s32.totalorder %s5525_s20, 3 }
   0xc   : > { %s5608_s28 = scalar_select %p125_p7, %s5513_s17, %s127_s24  }
   0xd   : > { %p180_p10 = pnand %p3885_p6, %p179_p9 }
   0xf   : > { %183 = sbr.rel (%p180_p10) target bundleno = 551 (0x227), region = 36 }
  0x16   : > { %v3888_v0 = vld [vmem:[%s6709_s1 + $0x8] sm:$0xff]  ;;  %v5616_v1 = vld [vmem:[%s6709_s1 + $0x20] sm:$0xff]  ;;  %p205_p11 = scmp.lt.s32.totalorder %s5517_s18, 1  ;;  %vm281_vm0 = vcmask 64512   ;;  %v4213_v9 = vld [vmem:[%s6709_s1 + $0x30] sm:$0xff]  ;;  %s202_s10 = sand.u32 1, %s5509_s16  }
  0x17   : > { %v246_v2 = vld [vmem:[%s6709_s1] sm:$0xff]  ;;  %4681 = vmatprep.subr.mxu1 %v3888_v0  ;;  %4881 = vmatprep.subr.mxu0 %v5616_v1  ;;  %v4148_v3 = vld [vmem:[%s6709_s1 + $0x28] sm:$0xff]  ;;  %v5650_v10 = vld [vmem:[%s6709_s1 + $0x10] sm:$0xff]  ;;  %s4383_s24 = sshll.u32 %s5517_s18, 12  ;;  %s5527_s7 = smov [#allocation2]  }
  0x18   : > { %4682 = vmatpush3.msra.mxu1 %v3888_v0  ;;  %4882 = vmatpush3.msra.mxu0 %v5616_v1  ;;  %s206_s11 = scalar_select %p205_p11, %s5517_s18, 1  ;;  %v5765_v28 = vld [vmem:[%s6709_s1 + $0x38] sm:$0xff] }
  0x19   : > { %4731 = vmatprep.subr.mxu1 %v246_v2  ;;  %4931 = vmatprep.subr.mxu0 %v4148_v3  ;;  %v5926_v61 = vld [vmem:[%s6709_s1 + $0x18] sm:$0xff]  ;;  %s6654_s5 = scalar_lea.hbm %s6712_s4, %s4383_s24  ;;  %s6662_s18 = scalar_lea.sflag [#allocation3], %s202_s10 }
  0x1a   : > { %s5389_s12 = smul.u32 432, %s206_s11  ;;  %s5451_s8 = sshll.u32 %s5527_s7, 4  ;;  %s5452_s8 = int_to_ptr.vmem [resolvable:$false] %s5451_s8 }
  0x1b   : > { %s5453_s9 = scalar_lea.vmem %s5452_s8, 8192 }
  0x1c   : > { %s5631_s21 = scalar_lea.vmem %s6708_s0, %s5389_s12 }
  0x1d   : > { %v247_v4 = vld [vmem:[%s5631_s21 + $0x1] sm:$0xff]  ;;  %v4051_v5 = vld [vmem:[%s5631_s21 + $0x19] sm:$0xff]  ;;  %v248_v6 = vld [vmem:[%s5631_s21 + $0x9] sm:$0xff] }
  0x1e   : > { %4683 = vmatprep.mubr.msk.f32.mxu1 %vm281_vm0, %v247_v4  ;;  %4883 = vmatprep.mubr.msk.f32.mxu0 %vm281_vm0, %v4051_v5  ;;  %v4052_v7 = vld [vmem:[%s5631_s21 + $0x21] sm:$0xff]  ;;  %v5640_v8 = vld [vmem:[%s5631_s21 + $0x31] sm:$0xff]  ;;  %v5653_v11 = vld [vmem:[%s5631_s21 + $0x39] sm:$0xff] }
  0x1f   : > { %4684 = vmatmul.mubr.msk.f32.vlgmr.msra.gmra.mrb[0].mxu1 %vm281_vm0, %v248_v6  ;;  %4884 = vmatmul.mubr.msk.f32.vlgmr.msra.gmra.mrb[0].mxu0 %vm281_vm0, %v4052_v7  ;;  %v5659_v12 = vld [vmem:[%s5631_s21 + $0x49] sm:$0xff]  ;;  %v5670_v13 = vld [vmem:[%s5631_s21 + $0x51] sm:$0xff]  ;;  %v5673_v14 = vld [vmem:[%s5631_s21 + $0x61] sm:$0xff] }
  0x20   : > { %4732 = vmatpush3.msra.mxu1 %v246_v2  ;;  %4932 = vmatpush3.msra.mxu0 %v4148_v3  ;;  %v5684_v15 = vld [vmem:[%s5631_s21 + $0x69] sm:$0xff]  ;;  %v5687_v16 = vld [vmem:[%s5631_s21 + $0x79] sm:$0xff]  ;;  %v5698_v17 = vld [vmem:[%s5631_s21 + $0x81] sm:$0xff] }
  0x21   : > { %4686 = vmatprep.mubr.msk.f32.mxu1 %vm281_vm0, %v4051_v5  ;;  %4886 = vmatprep.mubr.msk.f32.mxu0 %vm281_vm0, %v5640_v8  ;;  %v5701_v18 = vld [vmem:[%s5631_s21 + $0x91] sm:$0xff]  ;;  %v5712_v19 = vld [vmem:[%s5631_s21 + $0x99] sm:$0xff]  ;;  %v5715_v20 = vld [vmem:[%s5631_s21 + $0xa9] sm:$0xff] }
  0x22   : > { %4981 = vmatprep.subr.mxu0 %v4213_v9  ;;  %4781 = vmatprep.subr.mxu1 %v5650_v10  ;;  %v5726_v21 = vld [vmem:[%s5631_s21 + $0xb1] sm:$0xff]  ;;  %v5729_v22 = vld [vmem:[%s5631_s21 + $0xc1] sm:$0xff]  ;;  %v5740_v23 = vld [vmem:[%s5631_s21 + $0xc9] sm:$0xff] }
  0x23   : > { %4687 = vmatmul.mubr.msk.f32.gmra.mrb[2].mxu1 %vm281_vm0, %v4052_v7  ;;  %4887 = vmatmul.mubr.msk.f32.gmra.mrb[2].mxu0 %vm281_vm0, %v5653_v11  ;;  %v5743_v24 = vld [vmem:[%s5631_s21 + $0x1a] sm:$0xff]  ;;  %v5754_v25 = vld [vmem:[%s5631_s21 + $0x22] sm:$0xff]  ;;  %v5760_v27 = vld [vmem:[%s5631_s21 + $0x32] sm:$0xff] }
  0x24   : > { %4689 = vmatprep.mubr.msk.f32.mxu1 %vm281_vm0, %v5640_v8  ;;  %4889 = vmatprep.mubr.msk.f32.mxu0 %vm281_vm0, %v5659_v12  ;;  %v5757_v26 = vld [vmem:[%s5631_s21 + $0xd9] sm:$0xff]  ;;  %v5774_v29 = vld [vmem:[%s5631_s21 + $0xe1] sm:$0xff]  ;;  %v5782_v31 = vld [vmem:[%s5631_s21 + $0xf1] sm:$0xff] }
  0x25   : > { %6760 = vst [vmem:[#allocation5_spill] sm:$0xff] %v5774_v29  ;;  %v5777_v30 = vld [vmem:[%s5631_s21 + $0x3a] sm:$0xff]  ;;  %6761 = vst [vmem:[#allocation6_spill] sm:$0xff] %v5782_v31  ;;  %v5785_v32 = vld [vmem:[%s5631_s21 + $0x4a] sm:$0xff] }
  0x26   : > { %v5797_v33 = vld [vmem:[%s5631_s21 + $0xf9] sm:$0xff]  ;;  %v5803_v35 = vld [vmem:[%s5631_s21 + $0x109] sm:$0xff]  ;;  %v5817_v37 = vld [vmem:[%s5631_s21 + $0x111] sm:$0xff] }
  0x27   : > { %4690 = vmatmul.mubr.msk.f32.gmra.mrb[4].mxu1 %vm281_vm0, %v5653_v11  ;;  %4890 = vmatmul.mubr.msk.f32.gmra.mrb[4].mxu0 %vm281_vm0, %v5670_v13  ;;  %6762 = vst [vmem:[#allocation7_spill] sm:$0xff] %v5797_v33  ;;  %v5800_v34 = vld [vmem:[%s5631_s21 + $0x52] sm:$0xff]  ;;  %6763 = vst [vmem:[#allocation8_spill] sm:$0xff] %v5803_v35  ;;  %v5806_v36 = vld [vmem:[%s5631_s21 + $0x62] sm:$0xff] }
  0x28   : > { %4692 = vmatprep.mubr.msk.f32.mxu1 %vm281_vm0, %v5659_v12  ;;  %4892 = vmatprep.mubr.msk.f32.mxu0 %vm281_vm0, %v5673_v14  ;;  %6764 = vst [vmem:[#allocation9_spill] sm:$0xff] %v5817_v37  ;;  %v5820_v38 = vld [vmem:[%s5631_s21 + $0x6a] sm:$0xff]  ;;  %v5823_v39 = vld [vmem:[%s5631_s21 + $0x121] sm:$0xff]  ;;  %v5843_v43 = vld [vmem:[%s5631_s21 + $0x139] sm:$0xff] }
  0x29   : > { %6765 = vst [vmem:[#allocation10_spill] sm:$0xff] %v5823_v39  ;;  %v5826_v40 = vld [vmem:[%s5631_s21 + $0x7a] sm:$0xff]  ;;  %v5837_v41 = vld [vmem:[%s5631_s21 + $0x129] sm:$0xff]  ;;  %6767 = vst [vmem:[#allocation12_spill] sm:$0xff] %v5843_v43 }
  0x2a   : > { %6766 = vst [vmem:[#allocation11_spill] sm:$0xff] %v5837_v41  ;;  %v5840_v42 = vld [vmem:[%s5631_s21 + $0x82] sm:$0xff]  ;;  %v5846_v44 = vld [vmem:[%s5631_s21 + $0x92] sm:$0xff]  ;;  %v5860_v46 = vld [vmem:[%s5631_s21 + $0x9a] sm:$0xff] }
  0x2b   : > { %4693 = vmatmul.mubr.msk.f32.gmra.mrb[6].mxu1 %vm281_vm0, %v5670_v13  ;;  %4893 = vmatmul.mubr.msk.f32.gmra.mrb[6].mxu0 %vm281_vm0, %v5684_v15  ;;  %v5857_v45 = vld [vmem:[%s5631_s21 + $0x141] sm:$0xff]  ;;  %v5863_v47 = vld [vmem:[%s5631_s21 + $0x151] sm:$0xff]  ;;  %v5877_v49 = vld [vmem:[%s5631_s21 + $0x159] sm:$0xff] }
  0x2c   : > { %4695 = vmatprep.mubr.msk.f32.mxu1 %vm281_vm0, %v5673_v14  ;;  %4895 = vmatprep.mubr.msk.f32.mxu0 %vm281_vm0, %v5687_v16  ;;  %6768 = vst [vmem:[#allocation13_spill] sm:$0xff] %v5857_v45  ;;  %6769 = vst [vmem:[#allocation14_spill] sm:$0xff] %v5863_v47  ;;  %v5866_v48 = vld [vmem:[%s5631_s21 + $0xaa] sm:$0xff]  ;;  %v5880_v50 = vld [vmem:[%s5631_s21 + $0xb2] sm:$0xff] }
  0x2d   : > { %6770 = vst [vmem:[#allocation15_spill] sm:$0xff] %v5877_v49  ;;  %v5883_v51 = vld [vmem:[%s5631_s21 + $0x169] sm:$0xff]  ;;  %v5897_v53 = vld [vmem:[%s5631_s21 + $0x171] sm:$0xff]  ;;  %v214_v55 = vld [vmem:[%s5631_s21] sm:$0xff] }
  0x2e   : > { %6771 = vst [vmem:[#allocation16_spill] sm:$0xff] %v5883_v51  ;;  %v5886_v52 = vld [vmem:[%s5631_s21 + $0xc2] sm:$0xff]  ;;  %6772 = vst [vmem:[#allocation17_spill] sm:$0xff] %v5897_v53  ;;  %v5900_v54 = vld [vmem:[%s5631_s21 + $0xca] sm:$0xff] }
  0x2f   : > { %4696 = vmatmul.mubr.msk.f32.gmra.mrb[8].mxu1 %vm281_vm0, %v5684_v15  ;;  %4896 = vmatmul.mubr.msk.f32.gmra.mrb[8].mxu0 %vm281_vm0, %v5698_v17  ;;  %v5904_v56 = vld [vmem:[%s5631_s21 + $0xda] sm:$0xff]  ;;  %v215_v57 = vld [vmem:[%s5631_s21 + $0x8] sm:$0xff]  ;;  %v5921_v60 = vld [vmem:[%s5631_s21 + $0xf2] sm:$0xff] }
  0x30   : > { %4698 = vmatprep.mubr.msk.f32.mxu1 %vm281_vm0, %v5687_v16  ;;  %4898 = vmatprep.mubr.msk.f32.mxu0 %vm281_vm0, %v5701_v18  ;;  %v5915_v58 = vld [vmem:[%s5631_s21 + $0xe2] sm:$0xff]  ;;  %v5918_v59 = vld [vmem:[%s5631_s21 + $0x18] sm:$0xff]  ;;  %v5943_v0 = vld [vmem:[%s5631_s21 + $0x30] sm:$0xff] }
  0x31   : > { %6773 = vst [vmem:[#allocation18_spill] sm:$0xff] %v5918_v59  ;;  %v5935_v62 = vld [vmem:[%s5631_s21 + $0x20] sm:$0xff]  ;;  %6775 = vst [vmem:[#allocation20_spill] sm:$0xff] %v5943_v0  ;;  %v5946_v2 = vld [vmem:[%s5631_s21 + $0x10a] sm:$0xff] }
  0x32   : > { %6774 = vst [vmem:[#allocation19_spill] sm:$0xff] %v5935_v62  ;;  %v5938_v63 = vld [vmem:[%s5631_s21 + $0xfa] sm:$0xff]  ;;  %v5961_v4 = vld [vmem:[%s5631_s21 + $0x112] sm:$0xff]  ;;  %v5964_v5 = vld [vmem:[%s5631_s21 + $0x48] sm:$0xff] }
  0x33   : > { %4699 = vmatmul.mubr.msk.f32.gmra.mrb[10].mxu1 %vm281_vm0, %v5698_v17  ;;  %4899 = vmatmul.mubr.msk.f32.gmra.mrb[10].mxu0 %vm281_vm0, %v5712_v19  ;;  %v5958_v3 = vld [vmem:[%s5631_s21 + $0x38] sm:$0xff]  ;;  %6777 = vst [vmem:[#allocation22_spill] sm:$0xff] %v5964_v5  ;;  %v5967_v6 = vld [vmem:[%s5631_s21 + $0x122] sm:$0xff]  ;;  %v5978_v7 = vld [vmem:[%s5631_s21 + $0x50] sm:$0xff] }
  0x34   : > { %4701 = vmatprep.mubr.msk.f32.mxu1 %vm281_vm0, %v5701_v18  ;;  %4901 = vmatprep.mubr.msk.f32.mxu0 %vm281_vm0, %v5715_v20  ;;  %6776 = vst [vmem:[#allocation21_spill] sm:$0xff] %v5958_v3  ;;  %6778 = vst [vmem:[#allocation23_spill] sm:$0xff] %v5978_v7 }
  0x37   : > { %4702 = vmatmul.mubr.msk.f32.gmra.mrb[12].mxu1 %vm281_vm0, %v5712_v19  ;;  %4902 = vmatmul.mubr.msk.f32.gmra.mrb[12].mxu0 %vm281_vm0, %v5726_v21 }
  0x38   : > { %4704 = vmatprep.mubr.msk.f32.mxu1 %vm281_vm0, %v5715_v20  ;;  %4904 = vmatprep.mubr.msk.f32.mxu0 %vm281_vm0, %v5729_v22 }
  0x3b   : > { %4705 = vmatmul.mubr.msk.f32.gmra.mrb[14].mxu1 %vm281_vm0, %v5726_v21  ;;  %4905 = vmatmul.mubr.msk.f32.gmra.mrb[14].mxu0 %vm281_vm0, %v5740_v23 }
  0x3c   : > { %4707 = vmatprep.mubr.msk.f32.mxu1 %vm281_vm0, %v5729_v22  ;;  %4933 = vmatprep.mubr.msk.f32.mxu0 %vm281_vm0, %v5743_v24 }
  0x3f   : > { %4708 = vmatmul.mubr.msk.f32.gmra.mrb[16].mxu1 %vm281_vm0, %v5740_v23  ;;  %4934 = vmatmul.mubr.msk.f32.vlgmr.msra.gmra.mrb[0].mxu0 %vm281_vm0, %v5754_v25 }
  0x40   : > { %4982 = vmatpush3.msra.mxu0 %v4213_v9  ;;  %4710 = vmatprep.mubr.msk.f32.mxu1 %vm281_vm0, %v5757_v26  ;;  %v5981_v9 = vld [vmem:[%s5631_s21 + $0x12a] sm:$0xff] }
  0x41   : > { %4936 = vmatprep.mubr.msk.f32.mxu0 %vm281_vm0, %v5760_v27  ;;  %5031 = vmatprep.subr.mxu0 %v5765_v28 }
  0x43   : > { %4711 = vmatmul.mubr.msk.f32.gmra.mrb[18].mxu1 %vm281_vm0, %v5774_v29  ;;  %4937 = vmatmul.mubr.msk.f32.gmra.mrb[2].mxu0 %vm281_vm0, %v5777_v30  ;;  %v6078_v29 = vld [vmem:[%s5631_s21 + $0xd8] sm:$0xff] }
  0x44   : > { %4713 = vmatprep.mubr.msk.f32.mxu1 %vm281_vm0, %v5782_v31  ;;  %4939 = vmatprep.mubr.msk.f32.mxu0 %vm281_vm0, %v5785_v32  ;;  %v6061_v31 = vld [vmem:[%s5631_s21 + $0x18a] sm:$0xff] }
  0x45   : > { %6789 = vst [vmem:[#allocation34_spill] sm:$0xff] %v6061_v31 }
  0x47   : > { %4714 = vmatmul.mubr.msk.f32.gmra.mrb[20].mxu1 %vm281_vm0, %v5797_v33  ;;  %4940 = vmatmul.mubr.msk.f32.gmra.mrb[4].mxu0 %vm281_vm0, %v5800_v34  ;;  %v6047_v33 = vld [vmem:[%s5631_s21 + $0x182] sm:$0xff] }
  0x48   : > { %4716 = vmatprep.mubr.msk.f32.mxu1 %vm281_vm0, %v5803_v35  ;;  %4942 = vmatprep.mubr.msk.f32.mxu0 %vm281_vm0, %v5806_v36  ;;  %v6044_v35 = vld [vmem:[%s5631_s21 + $0xa8] sm:$0xff]  ;;  %6787 = vst [vmem:[#allocation32_spill] sm:$0xff] %v6047_v33 }
  0x49   : > { %6786 = vst [vmem:[#allocation31_spill] sm:$0xff] %v6044_v35 }
  0x4b   : > { %4717 = vmatmul.mubr.msk.f32.gmra.mrb[22].mxu1 %vm281_vm0, %v5817_v37  ;;  %4943 = vmatmul.mubr.msk.f32.gmra.mrb[6].mxu0 %vm281_vm0, %v5820_v38  ;;  %v6041_v37 = vld [vmem:[%s5631_s21 + $0x172] sm:$0xff] }
  0x4c   : > { %4719 = vmatprep.mubr.msk.f32.mxu1 %vm281_vm0, %v5823_v39  ;;  %4945 = vmatprep.mubr.msk.f32.mxu0 %vm281_vm0, %v5826_v40  ;;  %v6038_v39 = vld [vmem:[%s5631_s21 + $0x98] sm:$0xff]  ;;  %6785 = vst [vmem:[#allocation30_spill] sm:$0xff] %v6041_v37 }
  0x4d   : > { %6784 = vst [vmem:[#allocation29_spill] sm:$0xff] %v6038_v39 }
  0x4f   : > { %4720 = vmatmul.mubr.msk.f32.gmra.mrb[24].mxu1 %vm281_vm0, %v5837_v41  ;;  %4946 = vmatmul.mubr.msk.f32.gmra.mrb[8].mxu0 %vm281_vm0, %v5840_v42  ;;  %v6027_v41 = vld [vmem:[%s5631_s21 + $0x16a] sm:$0xff] }
  0x50   : > { %4722 = vmatprep.mubr.msk.f32.mxu1 %vm281_vm0, %v5843_v43  ;;  %4948 = vmatprep.mubr.msk.f32.mxu0 %vm281_vm0, %v5846_v44  ;;  %v6024_v43 = vld [vmem:[%s5631_s21 + $0x90] sm:$0xff] }
  0x51   : > { %6783 = vst [vmem:[#allocation28_spill] sm:$0xff] %v6024_v43 }
  0x53   : > { %4723 = vmatmul.mubr.msk.f32.gmra.mrb[26].mxu1 %vm281_vm0, %v5857_v45  ;;  %4949 = vmatmul.mubr.msk.f32.gmra.mrb[10].mxu0 %vm281_vm0, %v5860_v46  ;;  %v6021_v45 = vld [vmem:[%s5631_s21 + $0x15a] sm:$0xff] }
  0x54   : > { %4725 = vmatprep.mubr.msk.f32.mxu1 %vm281_vm0, %v5863_v47  ;;  %4951 = vmatprep.mubr.msk.f32.mxu0 %vm281_vm0, %v5866_v48  ;;  %v6018_v47 = vld [vmem:[%s5631_s21 + $0x80] sm:$0xff] }
  0x55   : > { %6782 = vst [vmem:[#allocation27_spill] sm:$0xff] %v6018_v47 }
  0x57   : > { %4726 = vmatmul.mubr.msk.f32.gmra.mrb[28].mxu1 %vm281_vm0, %v5877_v49  ;;  %4952 = vmatmul.mubr.msk.f32.gmra.mrb[12].mxu0 %vm281_vm0, %v5880_v50  ;;  %v6007_v49 = vld [vmem:[%s5631_s21 + $0x152] sm:$0xff] }
  0x58   : > { %4728 = vmatprep.mubr.msk.f32.mxu1 %vm281_vm0, %v5883_v51  ;;  %4954 = vmatprep.mubr.msk.f32.mxu0 %vm281_vm0, %v5886_v52  ;;  %v6004_v51 = vld [vmem:[%s5631_s21 + $0x78] sm:$0xff] }
  0x59   : > { %6781 = vst [vmem:[#allocation26_spill] sm:$0xff] %v6004_v51 }
  0x5b   : > { %4729 = vmatmul.mubr.msk.f32.gmra.mrb[30].mxu1 %vm281_vm0, %v5897_v53  ;;  %4955 = vmatmul.mubr.msk.f32.gmra.mrb[14].mxu0 %vm281_vm0, %v5900_v54  ;;  %v6001_v53 = vld [vmem:[%s5631_s21 + $0x142] sm:$0xff] }
  0x5c   : > { %4733 = vmatprep.mubr.msk.f32.mxu1 %vm281_vm0, %v214_v55  ;;  %4957 = vmatprep.mubr.msk.f32.mxu0 %vm281_vm0, %v5904_v56  ;;  %v5987_v55 = vld [vmem:[%s5631_s21 + $0x13a] sm:$0xff] }
  0x5f   : > { %4734 = vmatmul.mubr.msk.f32.vlgmr.msra.gmra.mrb[0].mxu1 %vm281_vm0, %v215_v57  ;;  %4958 = vmatmul.mubr.msk.f32.gmra.mrb[16].mxu0 %vm281_vm0, %v5915_v58  ;;  %v5998_v57 = vld [vmem:[%s5631_s21 + $0x68] sm:$0xff] }
  0x60   : > { %4782 = vmatpush3.msra.mxu1 %v5650_v10  ;;  %4736 = vmatprep.mubr.msk.f32.mxu1 %vm281_vm0, %v5918_v59  ;;  %v5984_v10 = vld [vmem:[%s5631_s21 + $0x60] sm:$0xff]  ;;  %6780 = vst [vmem:[#allocation25_spill] sm:$0xff] %v5998_v57 }
  0x61   : > { %4960 = vmatprep.mubr.msk.f32.mxu0 %vm281_vm0, %v5921_v60  ;;  %4831 = vmatprep.subr.mxu1 %v5926_v61  ;;  %6779 = vst [vmem:[#allocation24_spill] sm:$0xff] %v5984_v10  ;;  %v6064_v59 = vld [vmem:[%s5631_s21 + $0xc0] sm:$0xff] }
  0x63   : > { %4737 = vmatmul.mubr.msk.f32.gmra.mrb[2].mxu1 %vm281_vm0, %v5935_v62  ;;  %4961 = vmatmul.mubr.msk.f32.gmra.mrb[18].mxu0 %vm281_vm0, %v5938_v63  ;;  %v6058_v62 = vld [vmem:[%s5631_s21 + $0xb0] sm:$0xff] }
  0x64   : > { %4739 = vmatprep.mubr.msk.f32.mxu1 %vm281_vm0, %v5943_v0  ;;  %4963 = vmatprep.mubr.msk.f32.mxu0 %vm281_vm0, %v5946_v2  ;;  %6788 = vst [vmem:[#allocation33_spill] sm:$0xff] %v6058_v62 }
  0x67   : > { %4740 = vmatmul.mubr.msk.f32.gmra.mrb[4].mxu1 %vm281_vm0, %v5958_v3  ;;  %4964 = vmatmul.mubr.msk.f32.gmra.mrb[20].mxu0 %vm281_vm0, %v5961_v4 }
  0x68   : > { %4742 = vmatprep.mubr.msk.f32.mxu1 %vm281_vm0, %v5964_v5  ;;  %4966 = vmatprep.mubr.msk.f32.mxu0 %vm281_vm0, %v5967_v6 }
  0x6b   : > { %4743 = vmatmul.mubr.msk.f32.gmra.mrb[6].mxu1 %vm281_vm0, %v5978_v7  ;;  %4967 = vmatmul.mubr.msk.f32.gmra.mrb[22].mxu0 %vm281_vm0, %v5981_v9 }
  0x6c   : > { %4745 = vmatprep.mubr.msk.f32.mxu1 %vm281_vm0, %v5984_v10  ;;  %4969 = vmatprep.mubr.msk.f32.mxu0 %vm281_vm0, %v5987_v55 }
  0x6f   : > { %4746 = vmatmul.mubr.msk.f32.gmra.mrb[8].mxu1 %vm281_vm0, %v5998_v57  ;;  %4970 = vmatmul.mubr.msk.f32.gmra.mrb[24].mxu0 %vm281_vm0, %v6001_v53 }
  0x70   : > { %4748 = vmatprep.mubr.msk.f32.mxu1 %vm281_vm0, %v6004_v51  ;;  %4972 = vmatprep.mubr.msk.f32.mxu0 %vm281_vm0, %v6007_v49 }
  0x73   : > { %4749 = vmatmul.mubr.msk.f32.gmra.mrb[10].mxu1 %vm281_vm0, %v6018_v47  ;;  %4973 = vmatmul.mubr.msk.f32.gmra.mrb[26].mxu0 %vm281_vm0, %v6021_v45 }
  0x74   : > { %4751 = vmatprep.mubr.msk.f32.mxu1 %vm281_vm0, %v6024_v43  ;;  %4975 = vmatprep.mubr.msk.f32.mxu0 %vm281_vm0, %v6027_v41 }
  0x77   : > { %4752 = vmatmul.mubr.msk.f32.gmra.mrb[12].mxu1 %vm281_vm0, %v6038_v39  ;;  %4976 = vmatmul.mubr.msk.f32.gmra.mrb[28].mxu0 %vm281_vm0, %v6041_v37  ;;  %v6083_v37 = vld [vmem:[%s6709_s1 + $0x40] sm:$0xff] }
  0x78   : > { %4754 = vmatprep.mubr.msk.f32.mxu1 %vm281_vm0, %v6044_v35  ;;  %4978 = vmatprep.mubr.msk.f32.mxu0 %vm281_vm0, %v6047_v33  ;;  %v6075_v33 = vld [vmem:[%s5631_s21 + $0xc8] sm:$0xff] }
  0x79   : > { %6790 = vst [vmem:[#allocation35_spill] sm:$0xff] %v6075_v33 }
  0x7b   : > { %4755 = vmatmul.mubr.msk.f32.gmra.mrb[14].mxu1 %vm281_vm0, %v6058_v62  ;;  %4979 = vmatmul.mubr.msk.f32.gmra.mrb[30].mxu0 %vm281_vm0, %v6061_v31  ;;  %v6093_v31 = vld [vmem:[%s5631_s21 + $0xe0] sm:$0xff] }
  0x7c   : > { %4757 = vmatprep.mubr.msk.f32.mxu1 %vm281_vm0, %v6064_v59  ;;  %4983 = vmatprep.mubr.msk.f32.mxu0 %vm281_vm0, %v5943_v0  ;;  %v6098_v0 = vld [vmem:[%s5631_s21 + $0xf0] sm:$0xff] }
  0x7f   : > { %4758 = vmatmul.mubr.msk.f32.gmra.mrb[16].mxu1 %vm281_vm0, %v6075_v33  ;;  %4984 = vmatmul.mubr.msk.f32.vlgmr.msra.gmra.mrb[0].mxu0 %vm281_vm0, %v5958_v3  ;;  %v924_v3 = vld [vmem:[%s5631_s21 + $0x2] sm:$0xff] }
  0x80   : > { %5032 = vmatpush3.msra.mxu0 %v5765_v28  ;;  %4760 = vmatprep.mubr.msk.f32.mxu1 %vm281_vm0, %v6078_v29  ;;  %v6110_v28 = vld [vmem:[%s5631_s21 + $0xf8] sm:$0xff] }
  0x81   : > { %4986 = vmatprep.mubr.msk.f32.mxu0 %vm281_vm0, %v5964_v5  ;;  %5081 = vmatprep.subr.mxu0 %v6083_v37  ;;  %v6113_v5 = vld [vmem:[%s5631_s21 + $0x108] sm:$0xff] }
  0x83   : > { %4761 = vmatmul.mubr.msk.f32.gmra.mrb[18].mxu1 %vm281_vm0, %v6093_v31  ;;  %4987 = vmatmul.mubr.msk.f32.gmra.mrb[2].mxu0 %vm281_vm0, %v5978_v7  ;;  %v6124_v7 = vld [vmem:[%s5631_s21 + $0x110] sm:$0xff] }
  0x84   : > { %4763 = vmatprep.mubr.msk.f32.mxu1 %vm281_vm0, %v6098_v0  ;;  %4989 = vmatprep.mubr.msk.f32.mxu0 %vm281_vm0, %v5984_v10  ;;  %v6127_v10 = vld [vmem:[%s5631_s21 + $0x120] sm:$0xff] }
  0x87   : > { %4764 = vmatmul.mubr.msk.f32.gmra.mrb[20].mxu1 %vm281_vm0, %v6110_v28  ;;  %4990 = vmatmul.mubr.msk.f32.gmra.mrb[4].mxu0 %vm281_vm0, %v5998_v57  ;;  %v6138_v57 = vld [vmem:[%s5631_s21 + $0x128] sm:$0xff] }
  0x88   : > { %4766 = vmatprep.mubr.msk.f32.mxu1 %vm281_vm0, %v6113_v5  ;;  %4992 = vmatprep.mubr.msk.f32.mxu0 %vm281_vm0, %v6004_v51  ;;  %v6141_v51 = vld [vmem:[%s5631_s21 + $0x138] sm:$0xff] }
  0x8b   : > { %4767 = vmatmul.mubr.msk.f32.gmra.mrb[22].mxu1 %vm281_vm0, %v6124_v7  ;;  %4993 = vmatmul.mubr.msk.f32.gmra.mrb[6].mxu0 %vm281_vm0, %v6018_v47  ;;  %v6152_v47 = vld [vmem:[%s5631_s21 + $0x140] sm:$0xff] }
  0x8c   : > { %4769 = vmatprep.mubr.msk.f32.mxu1 %vm281_vm0, %v6127_v10  ;;  %4995 = vmatprep.mubr.msk.f32.mxu0 %vm281_vm0, %v6024_v43  ;;  %v6155_v43 = vld [vmem:[%s5631_s21 + $0x150] sm:$0xff] }
  0x8f   : > { %4770 = vmatmul.mubr.msk.f32.gmra.mrb[24].mxu1 %vm281_vm0, %v6138_v57  ;;  %4996 = vmatmul.mubr.msk.f32.gmra.mrb[8].mxu0 %vm281_vm0, %v6038_v39  ;;  %v6166_v39 = vld [vmem:[%s5631_s21 + $0x158] sm:$0xff] }
  0x90   : > { %4772 = vmatprep.mubr.msk.f32.mxu1 %vm281_vm0, %v6141_v51  ;;  %4998 = vmatprep.mubr.msk.f32.mxu0 %vm281_vm0, %v6044_v35  ;;  %v6169_v35 = vld [vmem:[%s5631_s21 + $0x168] sm:$0xff] }
  0x93   : > { %4773 = vmatmul.mubr.msk.f32.gmra.mrb[26].mxu1 %vm281_vm0, %v6152_v47  ;;  %4999 = vmatmul.mubr.msk.f32.gmra.mrb[10].mxu0 %vm281_vm0, %v6058_v62  ;;  %v6180_v62 = vld [vmem:[%s5631_s21 + $0x170] sm:$0xff] }
  0x94   : > { %4775 = vmatprep.mubr.msk.f32.mxu1 %vm281_vm0, %v6155_v43  ;;  %5001 = vmatprep.mubr.msk.f32.mxu0 %vm281_vm0, %v6064_v59 }
  0x97   : > { %4776 = vmatmul.mubr.msk.f32.gmra.mrb[28].mxu1 %vm281_vm0, %v6166_v39  ;;  %5002 = vmatmul.mubr.msk.f32.gmra.mrb[12].mxu0 %vm281_vm0, %v6075_v33  ;;  %v925_v33 = vld [vmem:[%s5631_s21 + $0xa] sm:$0xff] }
  0x98   : > { %4778 = vmatprep.mubr.msk.f32.mxu1 %vm281_vm0, %v6169_v35  ;;  %5004 = vmatprep.mubr.msk.f32.mxu0 %vm281_vm0, %v6078_v29 }
  0x9b   : > { %4779 = vmatmul.mubr.msk.f32.gmra.mrb[30].mxu1 %vm281_vm0, %v6180_v62  ;;  %5005 = vmatmul.mubr.msk.f32.gmra.mrb[14].mxu0 %vm281_vm0, %v6093_v31 }
  0x9c   : > { %4783 = vmatprep.mubr.msk.f32.mxu1 %vm281_vm0, %v924_v3  ;;  %5007 = vmatprep.mubr.msk.f32.mxu0 %vm281_vm0, %v6098_v0  ;;  %v6807_v3 = vld [vmem:[#allocation25_spill] sm:$0xff] }
  0x9f   : > { %4784 = vmatmul.mubr.msk.f32.vlgmr.msra.gmra.mrb[0].mxu1 %vm281_vm0, %v925_v33  ;;  %5008 = vmatmul.mubr.msk.f32.gmra.mrb[16].mxu0 %vm281_vm0, %v6110_v28  ;;  %v4211_v33 = vld [vmem:[%s5631_s21 + $0x198] sm:$0xff] }
  0xa0   : > { %4832 = vmatpush3.msra.mxu1 %v5926_v61  ;;  %4786 = vmatprep.mubr.msk.f32.mxu1 %vm281_vm0, %v5743_v24  ;;  %v6233_v24 = vld [vmem:[%s5631_s21 + $0x180] sm:$0xff] }
  0xa1   : > { %5010 = vmatprep.mubr.msk.f32.mxu0 %vm281_vm0, %v6113_v5  ;;  %5131 = vmatprep.subr.mxu1 %v5616_v1  ;;  %v4212_v61 = vld [vmem:[%s5631_s21 + $0x1a0] sm:$0xff] }
  0xa3   : > { %4787 = vmatmul.mubr.msk.f32.gmra.mrb[2].mxu1 %vm281_vm0, %v5754_v25  ;;  %5011 = vmatmul.mubr.msk.f32.gmra.mrb[18].mxu0 %vm281_vm0, %v6124_v7  ;;  %v6244_v25 = vld [vmem:[%s5631_s21 + $0x188] sm:$0xff] }
  0xa4   : > { %4789 = vmatprep.mubr.msk.f32.mxu1 %vm281_vm0, %v5760_v27  ;;  %5013 = vmatprep.mubr.msk.f32.mxu0 %vm281_vm0, %v6127_v10 }
  0xa7   : > { %4790 = vmatmul.mubr.msk.f32.gmra.mrb[4].mxu1 %vm281_vm0, %v5777_v30  ;;  %5014 = vmatmul.mubr.msk.f32.gmra.mrb[20].mxu0 %vm281_vm0, %v6138_v57 }
  0xa8   : > { %4792 = vmatprep.mubr.msk.f32.mxu1 %vm281_vm0, %v5785_v32  ;;  %5016 = vmatprep.mubr.msk.f32.mxu0 %vm281_vm0, %v6141_v51 }
  0xab   : > { %4793 = vmatmul.mubr.msk.f32.gmra.mrb[6].mxu1 %vm281_vm0, %v5800_v34  ;;  %5017 = vmatmul.mubr.msk.f32.gmra.mrb[22].mxu0 %vm281_vm0, %v6152_v47 }
  0xac   : > { %4795 = vmatprep.mubr.msk.f32.mxu1 %vm281_vm0, %v5806_v36  ;;  %5019 = vmatprep.mubr.msk.f32.mxu0 %vm281_vm0, %v6155_v43 }
  0xaf   : > { %4796 = vmatmul.mubr.msk.f32.gmra.mrb[8].mxu1 %vm281_vm0, %v5820_v38  ;;  %5020 = vmatmul.mubr.msk.f32.gmra.mrb[24].mxu0 %vm281_vm0, %v6166_v39 }
  0xb0   : > { %4798 = vmatprep.mubr.msk.f32.mxu1 %vm281_vm0, %v5826_v40  ;;  %5022 = vmatprep.mubr.msk.f32.mxu0 %vm281_vm0, %v6169_v35 }
  0xb3   : > { %4799 = vmatmul.mubr.msk.f32.gmra.mrb[10].mxu1 %vm281_vm0, %v5840_v42  ;;  %5023 = vmatmul.mubr.msk.f32.gmra.mrb[26].mxu0 %vm281_vm0, %v6180_v62 }
  0xb4   : > { %4801 = vmatprep.mubr.msk.f32.mxu1 %vm281_vm0, %v5846_v44  ;;  %5025 = vmatprep.mubr.msk.f32.mxu0 %vm281_vm0, %v6233_v24 }
  0xb7   : > { %4802 = vmatmul.mubr.msk.f32.gmra.mrb[12].mxu1 %vm281_vm0, %v5860_v46  ;;  %5026 = vmatmul.mubr.msk.f32.gmra.mrb[28].mxu0 %vm281_vm0, %v6244_v25 }
  0xb8   : > { %4804 = vmatprep.mubr.msk.f32.mxu1 %vm281_vm0, %v5866_v48  ;;  %5028 = vmatprep.mubr.msk.f32.mxu0 %vm281_vm0, %v4211_v33  ;;  %v6808_v33 = vld [vmem:[#allocation13_spill] sm:$0xff] }
  0xbb   : > { %4805 = vmatmul.mubr.msk.f32.gmra.mrb[14].mxu1 %vm281_vm0, %v5880_v50  ;;  %5029 = vmatmul.mubr.msk.f32.gmra.mrb[30].mxu0 %vm281_vm0, %v4212_v61  ;;  %v6809_v61 = vld [vmem:[#allocation26_spill] sm:$0xff] }
  0xbc   : > { %4807 = vmatprep.mubr.msk.f32.mxu1 %vm281_vm0, %v5886_v52  ;;  %5033 = vmatprep.mubr.msk.f32.mxu0 %vm281_vm0, %v5640_v8  ;;  %v6791_v8 = vld [vmem:[#allocation30_spill] sm:$0xff] }
  0xbf   : > { %4808 = vmatmul.mubr.msk.f32.gmra.mrb[16].mxu1 %vm281_vm0, %v5900_v54  ;;  %5034 = vmatmul.mubr.msk.f32.vlgmr.msra.gmra.mrb[0].mxu0 %vm281_vm0, %v5653_v11  ;;  %v6792_v11 = vld [vmem:[#allocation5_spill] sm:$0xff] }
  0xc0   : > { %5082 = vmatpush3.msra.mxu0 %v6083_v37  ;;  %4810 = vmatprep.mubr.msk.f32.mxu1 %vm281_vm0, %v5904_v56  ;;  %v6806_v37 = vld [vmem:[#allocation12_spill] sm:$0xff] }
  0xc1   : > { %5036 = vmatprep.mubr.msk.f32.mxu0 %vm281_vm0, %v5659_v12  ;;  %v6793_v12 = vld [vmem:[#allocation18_spill] sm:$0xff] }
  0xc3   : > { %4811 = vmatmul.mubr.msk.f32.gmra.mrb[18].mxu1 %vm281_vm0, %v5915_v58  ;;  %5037 = vmatmul.mubr.msk.f32.gmra.mrb[2].mxu0 %vm281_vm0, %v5670_v13  ;;  %v6794_v13 = vld [vmem:[#allocation6_spill] sm:$0xff] }
  0xc4   : > { %4813 = vmatprep.mubr.msk.f32.mxu1 %vm281_vm0, %v5921_v60  ;;  %5039 = vmatprep.mubr.msk.f32.mxu0 %vm281_vm0, %v5673_v14  ;;  %v6795_v14 = vld [vmem:[#allocation19_spill] sm:$0xff] }
  0xc7   : > { %4814 = vmatmul.mubr.msk.f32.gmra.mrb[20].mxu1 %vm281_vm0, %v5938_v63  ;;  %5040 = vmatmul.mubr.msk.f32.gmra.mrb[4].mxu0 %vm281_vm0, %v5684_v15  ;;  %v6796_v15 = vld [vmem:[#allocation7_spill] sm:$0xff] }
  0xc8   : > { %4816 = vmatprep.mubr.msk.f32.mxu1 %vm281_vm0, %v5946_v2  ;;  %5042 = vmatprep.mubr.msk.f32.mxu0 %vm281_vm0, %v5687_v16  ;;  %v6797_v16 = vld [vmem:[#allocation20_spill] sm:$0xff] }
  0xcb   : > { %4817 = vmatmul.mubr.msk.f32.gmra.mrb[22].mxu1 %vm281_vm0, %v5961_v4  ;;  %5043 = vmatmul.mubr.msk.f32.gmra.mrb[6].mxu0 %vm281_vm0, %v5698_v17  ;;  %v6798_v17 = vld [vmem:[#allocation8_spill] sm:$0xff] }
  0xcc   : > { %4819 = vmatprep.mubr.msk.f32.mxu1 %vm281_vm0, %v5967_v6  ;;  %5045 = vmatprep.mubr.msk.f32.mxu0 %vm281_vm0, %v5701_v18  ;;  %v6799_v18 = vld [vmem:[#allocation21_spill] sm:$0xff] }
  0xcf   : > { %4820 = vmatmul.mubr.msk.f32.gmra.mrb[24].mxu1 %vm281_vm0, %v5981_v9  ;;  %5046 = vmatmul.mubr.msk.f32.gmra.mrb[8].mxu0 %vm281_vm0, %v5712_v19  ;;  %v6800_v19 = vld [vmem:[#allocation9_spill] sm:$0xff] }
  0xd0   : > { %4822 = vmatprep.mubr.msk.f32.mxu1 %vm281_vm0, %v5987_v55  ;;  %5048 = vmatprep.mubr.msk.f32.mxu0 %vm281_vm0, %v5715_v20  ;;  %v6801_v20 = vld [vmem:[#allocation22_spill] sm:$0xff] }
  0xd3   : > { %4823 = vmatmul.mubr.msk.f32.gmra.mrb[26].mxu1 %vm281_vm0, %v6001_v53  ;;  %5049 = vmatmul.mubr.msk.f32.gmra.mrb[10].mxu0 %vm281_vm0, %v5726_v21  ;;  %v6802_v21 = vld [vmem:[#allocation10_spill] sm:$0xff] }
  0xd4   : > { %4825 = vmatprep.mubr.msk.f32.mxu1 %vm281_vm0, %v6007_v49  ;;  %5051 = vmatprep.mubr.msk.f32.mxu0 %vm281_vm0, %v5729_v22  ;;  %v6804_v22 = vld [vmem:[#allocation11_spill] sm:$0xff] }
  0xd7   : > { %4826 = vmatmul.mubr.msk.f32.gmra.mrb[28].mxu1 %vm281_vm0, %v6021_v45  ;;  %5052 = vmatmul.mubr.msk.f32.gmra.mrb[12].mxu0 %vm281_vm0, %v5740_v23  ;;  %v6805_v23 = vld [vmem:[#allocation24_spill] sm:$0xff] }
  0xd8   : > { %4828 = vmatprep.mubr.msk.f32.mxu1 %vm281_vm0, %v6027_v41  ;;  %5054 = vmatprep.mubr.msk.f32.mxu0 %vm281_vm0, %v5757_v26 }
  0xdb   : > { %4829 = vmatmul.mubr.msk.f32.gmra.mrb[30].mxu1 %vm281_vm0, %v6791_v8  ;;  %5055 = vmatmul.mubr.msk.f32.gmra.mrb[14].mxu0 %vm281_vm0, %v6792_v11  ;;  %v6818_v8 = vld [vmem:[#allocation33_spill] sm:$0xff] }
  0xdc   : > { %4833 = vmatprep.mubr.msk.f32.mxu1 %vm281_vm0, %v6793_v12  ;;  %5057 = vmatprep.mubr.msk.f32.mxu0 %vm281_vm0, %v6794_v13  ;;  %v6810_v12 = vld [vmem:[#allocation14_spill] sm:$0xff] }
  0xdf   : > { %4834 = vmatmul.mubr.msk.f32.vlgmr.msra.gmra.mrb[0].mxu1 %vm281_vm0, %v6795_v14  ;;  %5058 = vmatmul.mubr.msk.f32.gmra.mrb[16].mxu0 %vm281_vm0, %v6796_v15  ;;  %v6811_v14 = vld [vmem:[#allocation27_spill] sm:$0xff] }
  0xe0   : > { %5132 = vmatpush3.msra.mxu1 %v5616_v1  ;;  %4836 = vmatprep.mubr.msk.f32.mxu1 %vm281_vm0, %v6797_v16  ;;  %v6803_v1 = vld [vmem:[#allocation23_spill] sm:$0xff] }
  0xe1   : > { %5060 = vmatprep.mubr.msk.f32.mxu0 %vm281_vm0, %v6798_v17  ;;  %v6812_v16 = vld [vmem:[#allocation15_spill] sm:$0xff] }
  0xe3   : > { %4837 = vmatmul.mubr.msk.f32.gmra.mrb[2].mxu1 %vm281_vm0, %v6799_v18  ;;  %5061 = vmatmul.mubr.msk.f32.gmra.mrb[18].mxu0 %vm281_vm0, %v6800_v19  ;;  %v6813_v18 = vld [vmem:[#allocation28_spill] sm:$0xff] }
  0xe4   : > { %4839 = vmatprep.mubr.msk.f32.mxu1 %vm281_vm0, %v6801_v20  ;;  %5063 = vmatprep.mubr.msk.f32.mxu0 %vm281_vm0, %v6802_v21  ;;  %v6814_v20 = vld [vmem:[#allocation16_spill] sm:$0xff] }
  0xe7   : > { %4840 = vmatmul.mubr.msk.f32.gmra.mrb[4].mxu1 %vm281_vm0, %v6803_v1  ;;  %5064 = vmatmul.mubr.msk.f32.gmra.mrb[20].mxu0 %vm281_vm0, %v6804_v22  ;;  %v6369_v1 = vld [vmem:[%s5631_s21 + $0x181] sm:$0xff] }
  0xe8   : > { %4842 = vmatprep.mubr.msk.f32.mxu1 %vm281_vm0, %v6805_v23  ;;  %5066 = vmatprep.mubr.msk.f32.mxu0 %vm281_vm0, %v6806_v37  ;;  %v6815_v23 = vld [vmem:[#allocation29_spill] sm:$0xff] }
  0xeb   : > { %4843 = vmatmul.mubr.msk.f32.gmra.mrb[6].mxu1 %vm281_vm0, %v6807_v3  ;;  %5067 = vmatmul.mubr.msk.f32.gmra.mrb[22].mxu0 %vm281_vm0, %v6808_v33  ;;  %v6816_v3 = vld [vmem:[#allocation17_spill] sm:$0xff] }
  0xec   : > { %4845 = vmatprep.mubr.msk.f32.mxu1 %vm281_vm0, %v6809_v61  ;;  %5069 = vmatprep.mubr.msk.f32.mxu0 %vm281_vm0, %v6810_v12  ;;  %v6817_v61 = vld [vmem:[#allocation31_spill] sm:$0xff] }
  0xef   : > { %4846 = vmatmul.mubr.msk.f32.gmra.mrb[8].mxu1 %vm281_vm0, %v6811_v14  ;;  %5070 = vmatmul.mubr.msk.f32.gmra.mrb[24].mxu0 %vm281_vm0, %v6812_v16  ;;  %v6380_v14 = vld [vmem:[%s5631_s21 + $0x189] sm:$0xff] }
  0xf0   : > { %4848 = vmatprep.mubr.msk.f32.mxu1 %vm281_vm0, %v6813_v18  ;;  %5072 = vmatprep.mubr.msk.f32.mxu0 %vm281_vm0, %v6814_v20  ;;  %v4276_v18 = vld [vmem:[%s5631_s21 + $0x199] sm:$0xff] }
  0xf3   : > { %4849 = vmatmul.mubr.msk.f32.gmra.mrb[10].mxu1 %vm281_vm0, %v6815_v23  ;;  %5073 = vmatmul.mubr.msk.f32.gmra.mrb[26].mxu0 %vm281_vm0, %v6816_v3  ;;  %v4277_v23 = vld [vmem:[%s5631_s21 + $0x1a1] sm:$0xff]  ;;  %v6819_v3 = vld [vmem:[#allocation35_spill] sm:$0xff] }
  0xf4   : > { %4851 = vmatprep.mubr.msk.f32.mxu1 %vm281_vm0, %v6817_v61  ;;  %5075 = vmatprep.mubr.msk.f32.mxu0 %vm281_vm0, %v6369_v1 }
  0xf7   : > { %4852 = vmatmul.mubr.msk.f32.gmra.mrb[12].mxu1 %vm281_vm0, %v6818_v8  ;;  %5076 = vmatmul.mubr.msk.f32.gmra.mrb[28].mxu0 %vm281_vm0, %v6380_v14 }
  0xf8   : > { %4854 = vmatprep.mubr.msk.f32.mxu1 %vm281_vm0, %v6064_v59  ;;  %5078 = vmatprep.mubr.msk.f32.mxu0 %vm281_vm0, %v4276_v18 }
  0xfb   : > { %4855 = vmatmul.mubr.msk.f32.gmra.mrb[14].mxu1 %vm281_vm0, %v6819_v3  ;;  %5079 = vmatmul.mubr.msk.f32.gmra.mrb[30].mxu0 %vm281_vm0, %v4277_v23 }
  0xfc   : > { %4857 = vmatprep.mubr.msk.f32.mxu1 %vm281_vm0, %v6078_v29  ;;  %5083 = vmatprep.mubr.msk.f32.mxu0 %vm281_vm0, %v5760_v27  ;;  %v6821_v27 = vld [vmem:[#allocation32_spill] sm:$0xff] }
  0xfd   : > { %v4341_v29 = vld [vmem:[%s5631_s21 + $0x19a] sm:$0xff] }
  0xff   : > { %4858 = vmatmul.mubr.msk.f32.gmra.mrb[16].mxu1 %vm281_vm0, %v6093_v31  ;;  %5084 = vmatmul.mubr.msk.f32.vlgmr.msra.gmra.mrb[0].mxu0 %vm281_vm0, %v5777_v30  ;;  %v6822_v30 = vld [vmem:[#allocation17_spill] sm:$0xff]  ;;  %v6823_v31 = vld [vmem:[#allocation34_spill] sm:$0xff] }
 0x100   : > { %4860 = vmatprep.mubr.msk.f32.mxu1 %vm281_vm0, %v6098_v0  ;;  %5086 = vmatprep.mubr.msk.f32.mxu0 %vm281_vm0, %v5785_v32  ;;  %v4342_v32 = vld [vmem:[%s5631_s21 + $0x1a2] sm:$0xff]  ;;  %s3886_s21 = sshll.u32 %s202_s10, 8 }
 0x101   : > { %s6553_s22 = scalar_lea.vmem [#allocation2], %s3886_s21 }
 0x102   : > { %s3798_s26 = sshll.u32 %s6553_s22, 4  ;;  %s6656_s26 = int_to_ptr.vmem [resolvable:$true] %s3798_s26 }
 0x103   : > { %4861 = vmatmul.mubr.msk.f32.gmra.mrb[18].mxu1 %vm281_vm0, %v6110_v28  ;;  %5087 = vmatmul.mubr.msk.f32.gmra.mrb[2].mxu0 %vm281_vm0, %v5800_v34  ;;  %s5447_s6 = scalar_lea.vmem %s6656_s26, 4096  ;;  %p5454_p1 = scmp.lt.s32.totalorder %s6656_s26, %s5452_s8 }
 0x104   : > { %4863 = vmatprep.mubr.msk.f32.mxu1 %vm281_vm0, %v6113_v5  ;;  %5089 = vmatprep.mubr.msk.f32.mxu0 %vm281_vm0, %v5806_v36  ;;  %p5448_p12 = scmp.ne.s32.totalorder %s6656_s26, %s5447_s6  ;;  %p5455_p2 = scmp.lt.s32.totalorder %s5453_s9, %s5447_s6 }
 0x106   : > { %p5449_p13 = pnand %p5448_p12, %p5595_p4  ;;  %p5456_p3 = por %p5455_p2, %p5454_p1 }
 0x107   : > { %4864 = vmatmul.mubr.msk.f32.gmra.mrb[20].mxu1 %vm281_vm0, %v6124_v7  ;;  %5090 = vmatmul.mubr.msk.f32.gmra.mrb[4].mxu0 %vm281_vm0, %v5820_v38 }
 0x108   : > { %4866 = vmatprep.mubr.msk.f32.mxu1 %vm281_vm0, %v6127_v10  ;;  %5092 = vmatprep.mubr.msk.f32.mxu0 %vm281_vm0, %v5826_v40  ;;  %p5450_p0 = pneg %p5449_p13 }
 0x10a   : > { %p5457_p5 = pnand %p5456_p3, %p5450_p0 }
 0x10b   : > { %4867 = vmatmul.mubr.msk.f32.gmra.mrb[22].mxu1 %vm281_vm0, %v6138_v57  ;;  %5093 = vmatmul.mubr.msk.f32.gmra.mrb[6].mxu0 %vm281_vm0, %v5840_v42 }
 0x10c   : > { %4869 = vmatprep.mubr.msk.f32.mxu1 %vm281_vm0, %v6141_v51  ;;  %5095 = vmatprep.mubr.msk.f32.mxu0 %vm281_vm0, %v5846_v44 }
 0x10f   : > { %4870 = vmatmul.mubr.msk.f32.gmra.mrb[24].mxu1 %vm281_vm0, %v6152_v47  ;;  %5096 = vmatmul.mubr.msk.f32.gmra.mrb[8].mxu0 %vm281_vm0, %v5860_v46 }
 0x110   : > { %4872 = vmatprep.mubr.msk.f32.mxu1 %vm281_vm0, %v6155_v43  ;;  %5098 = vmatprep.mubr.msk.f32.mxu0 %vm281_vm0, %v5866_v48 }
 0x113   : > { %4873 = vmatmul.mubr.msk.f32.gmra.mrb[26].mxu1 %vm281_vm0, %v6166_v39  ;;  %5099 = vmatmul.mubr.msk.f32.gmra.mrb[10].mxu0 %vm281_vm0, %v5880_v50 }
 0x114   : > { %4875 = vmatprep.mubr.msk.f32.mxu1 %vm281_vm0, %v6169_v35  ;;  %5101 = vmatprep.mubr.msk.f32.mxu0 %vm281_vm0, %v5886_v52  ;;  %v6538_v52 = vld [vmem:[%s6710_s2] ss:$0 sm:$0xff] }
 0x117   : > { %4876 = vmatmul.mubr.msk.f32.gmra.mrb[28].mxu1 %vm281_vm0, %v6180_v62  ;;  %5102 = vmatmul.mubr.msk.f32.gmra.mrb[12].mxu0 %vm281_vm0, %v5900_v54 }
 0x118   : > { %4878 = vmatprep.mubr.msk.f32.mxu1 %vm281_vm0, %v6233_v24  ;;  %5104 = vmatprep.mubr.msk.f32.mxu0 %vm281_vm0, %v5904_v56  ;;  %v6543_v56 = vld [vmem:[%s6711_s3] ss:$0 sm:$0xff] }
 0x11b   : > { %4879 = vmatmul.mubr.msk.f32.gmra.mrb[30].mxu1 %vm281_vm0, %v6244_v25  ;;  %5105 = vmatmul.mubr.msk.f32.gmra.mrb[14].mxu0 %vm281_vm0, %v5915_v58 }
 0x11c   : > { %4907 = vmatprep.mubr.msk.f32.mxu1 %vm281_vm0, %v5757_v26  ;;  %5107 = vmatprep.mubr.msk.f32.mxu0 %vm281_vm0, %v5921_v60  ;;  %v6820_v26 = vld [vmem:[#allocation30_spill] sm:$0xff] }
 0x11f   : > { %4908 = vmatmul.mubr.msk.f32.vlgmr.msra.gmra.mrb[16].mxu1 %vm281_vm0, %v6792_v11  ;;  %5108 = vmatmul.mubr.msk.f32.gmra.mrb[16].mxu0 %vm281_vm0, %v5938_v63 }
 0x120   : > { %4910 = vmatprep.mubr.msk.f32.mxu1 %vm281_vm0, %v6794_v13  ;;  %5110 = vmatprep.mubr.msk.f32.mxu0 %vm281_vm0, %v5946_v2 }
 0x123   : > { %4911 = vmatmul.mubr.msk.f32.gmra.mrb[18].mxu1 %vm281_vm0, %v6796_v15  ;;  %5111 = vmatmul.mubr.msk.f32.gmra.mrb[18].mxu0 %vm281_vm0, %v5961_v4 }
 0x124   : > { %4913 = vmatprep.mubr.msk.f32.mxu1 %vm281_vm0, %v6798_v17  ;;  %5113 = vmatprep.mubr.msk.f32.mxu0 %vm281_vm0, %v5967_v6 }
 0x127   : > { %4914 = vmatmul.mubr.msk.f32.gmra.mrb[20].mxu1 %vm281_vm0, %v6800_v19  ;;  %5114 = vmatmul.mubr.msk.f32.gmra.mrb[20].mxu0 %vm281_vm0, %v5981_v9 }
 0x128   : > { %4916 = vmatprep.mubr.msk.f32.mxu1 %vm281_vm0, %v6802_v21  ;;  %5116 = vmatprep.mubr.msk.f32.mxu0 %vm281_vm0, %v5987_v55 }
 0x12b   : > { %4917 = vmatmul.mubr.msk.f32.gmra.mrb[22].mxu1 %vm281_vm0, %v6804_v22  ;;  %5117 = vmatmul.mubr.msk.f32.gmra.mrb[22].mxu0 %vm281_vm0, %v6001_v53 }
 0x12c   : > { %4919 = vmatprep.mubr.msk.f32.mxu1 %vm281_vm0, %v6806_v37  ;;  %5119 = vmatprep.mubr.msk.f32.mxu0 %vm281_vm0, %v6007_v49 }
 0x12f   : > { %4920 = vmatmul.mubr.msk.f32.gmra.mrb[24].mxu1 %vm281_vm0, %v6808_v33  ;;  %5120 = vmatmul.mubr.msk.f32.gmra.mrb[24].mxu0 %vm281_vm0, %v6021_v45 }
 0x130   : > { %4922 = vmatprep.mubr.msk.f32.mxu1 %vm281_vm0, %v6810_v12  ;;  %5122 = vmatprep.mubr.msk.f32.mxu0 %vm281_vm0, %v6027_v41 }
 0x133   : > { %4923 = vmatmul.mubr.msk.f32.gmra.mrb[26].mxu1 %vm281_vm0, %v6812_v16  ;;  %5123 = vmatmul.mubr.msk.f32.gmra.mrb[26].mxu0 %vm281_vm0, %v6820_v26 }
 0x134   : > { %4925 = vmatprep.mubr.msk.f32.mxu1 %vm281_vm0, %v6814_v20  ;;  %5125 = vmatprep.mubr.msk.f32.mxu0 %vm281_vm0, %v6821_v27 }
 0x137   : > { %4926 = vmatmul.mubr.msk.f32.gmra.mrb[28].mxu1 %vm281_vm0, %v6822_v30  ;;  %5126 = vmatmul.mubr.msk.f32.gmra.mrb[28].mxu0 %vm281_vm0, %v6823_v31 }
 0x138   : > { %4928 = vmatprep.mubr.msk.f32.mxu1 %vm281_vm0, %v6369_v1  ;;  %5128 = vmatprep.mubr.msk.f32.mxu0 %vm281_vm0, %v4341_v29 }
 0x13b   : > { %4929 = vmatmul.mubr.msk.f32.gmra.mrb[30].mxu1 %vm281_vm0, %v6380_v14  ;;  %5129 = vmatmul.mubr.msk.f32.gmra.mrb[30].mxu0 %vm281_vm0, %v4342_v32 }
 0x1b2   : > { %v4835_v34 = vpop.f32.mrb[0].mxu1 }
 0x1b3   : > { %v1510_v35 = vpop.f32.mrb[1].mxu1 }
 0x1b6   : > { %v4838_v36 = vpop.f32.mrb[2].mxu1 }
 0x1b7   : > { %v1520_v38 = vpop.f32.mrb[3].mxu1 }
 0x1ba   : > { %v4841_v39 = vpop.f32.mrb[4].mxu1 }
 0x1bb   : > { %v1530_v40 = vpop.f32.mrb[5].mxu1 }
 0x1be   : > { %v4844_v41 = vpop.f32.mrb[6].mxu1 }
 0x1bf   : > { %v1540_v42 = vpop.f32.mrb[7].mxu1 }
 0x1c2   : > { %v4847_v43 = vpop.f32.mrb[8].mxu1 }
 0x1c3   : > { %v1550_v44 = vpop.f32.mrb[9].mxu1 }
 0x1c6   : > { %v6522_v45 = vpop.f32.mrb[10].mxu1 }
 0x1c7   : > { %v6524_v46 = vpop.f32.mrb[11].mxu1 }
 0x1ca   : > { %v6526_v47 = vpop.f32.mrb[12].mxu1 }
 0x1cb   : > { %v6528_v48 = vpop.f32.mrb[13].mxu1 }
 0x1ce   : > { %v6530_v49 = vpop.f32.mrb[14].mxu1 }
 0x1cf   : > { %v6532_v50 = vpop.f32.mrb[15].mxu1 }
 0x1d2   : > { %v5085_v51 = vpop.f32.mrb[0].mxu0 }
 0x1d3   : > { %v5133_v53 = vadd.f32 %v5085_v51, %v4835_v34  ;;  %v3448_v54 = vpop.f32.mrb[1].mxu0 }
 0x1d4   : > { %v5134_v58 = vadd.f32 %v3448_v54, %v1510_v35 }
 0x1d5   : > { %v3647_v59 = vmul.f32 %v5133_v53, %v6538_v52 }
 0x1d6   : > { %v3646_v60 = vmul.f32 %v5134_v58, %v6538_v52  ;;  %v5088_v62 = vpop.f32.mrb[2].mxu0 }
 0x1d7   : > { %v3686_v63 = vadd.f32 %v6543_v56, %v3647_v59  ;;  %v5135_v0 = vadd.f32 %v5088_v62, %v4838_v36  ;;  %v3458_v2 = vpop.f32.mrb[3].mxu0 }
 0x1d8   : > { %v3685_v4 = vadd.f32 %v6543_v56, %v3646_v60  ;;  %v5136_v5 = vadd.f32 %v3458_v2, %v1520_v38 }
 0x1d9   : > { %v3718_v6 = vmax.f32 %v3686_v63, 0.0  ;;  %v3649_v7 = vmul.f32 %v5135_v0, %v6538_v52 }
 0x1da   : > { %v3717_v9 = vmax.f32 %v3685_v4, 0.0  ;;  %v3648_v10 = vmul.f32 %v5136_v5, %v6538_v52  ;;  %v5091_v55 = vpop.f32.mrb[4].mxu0 }
 0x1db   : > { %3750 = vst [vmem:[%s6553_s22 + $0x8] sm:$0xff] %v3718_v6  ;;  %v3688_v57 = vadd.f32 %v6543_v56, %v3649_v7  ;;  %v5137_v28 = vadd.f32 %v5091_v55, %v4841_v39  ;;  %v3468_v24 = vpop.f32.mrb[5].mxu0 }
 0x1dc   : > { %3749 = vst [vmem:[%s6553_s22] sm:$0xff] %v3717_v9  ;;  %v3687_v25 = vadd.f32 %v6543_v56, %v3648_v10  ;;  %v5138_v8 = vadd.f32 %v3468_v24, %v1530_v40 }
 0x1dd   : > { %v3720_v11 = vmax.f32 %v3688_v57, 0.0  ;;  %v3651_v13 = vmul.f32 %v5137_v28, %v6538_v52 }
 0x1de   : > { %v3719_v15 = vmax.f32 %v3687_v25, 0.0  ;;  %v3650_v17 = vmul.f32 %v5138_v8, %v6538_v52  ;;  %v5094_v19 = vpop.f32.mrb[6].mxu0 }
 0x1df   : > { %3752 = vst [vmem:[%s6553_s22 + $0x18] sm:$0xff] %v3720_v11  ;;  %v3690_v21 = vadd.f32 %v6543_v56, %v3651_v13  ;;  %v5139_v22 = vadd.f32 %v5094_v19, %v4844_v41  ;;  %v3478_v37 = vpop.f32.mrb[7].mxu0 }
 0x1e0   : > { %3751 = vst [vmem:[%s6553_s22 + $0x10] sm:$0xff] %v3719_v15  ;;  %v3689_v33 = vadd.f32 %v6543_v56, %v3650_v17  ;;  %v5140_v12 = vadd.f32 %v3478_v37, %v1540_v42 }
 0x1e1   : > { %v3722_v16 = vmax.f32 %v3690_v21, 0.0  ;;  %v3653_v20 = vmul.f32 %v5139_v22, %v6538_v52 }
 0x1e2   : > { %v3721_v1 = vmax.f32 %v3689_v33, 0.0  ;;  %v3652_v3 = vmul.f32 %v5140_v12, %v6538_v52  ;;  %v5097_v61 = vpop.f32.mrb[8].mxu0 }
 0x1e3   : > { %3754 = vst [vmem:[%s6553_s22 + $0x28] sm:$0xff] %v3722_v16  ;;  %v3692_v14 = vadd.f32 %v6543_v56, %v3653_v20  ;;  %v5141_v18 = vadd.f32 %v5097_v61, %v4847_v43  ;;  %v3488_v23 = vpop.f32.mrb[9].mxu0 }
 0x1e4   : > { %3753 = vst [vmem:[%s6553_s22 + $0x20] sm:$0xff] %v3721_v1  ;;  %v3691_v26 = vadd.f32 %v6543_v56, %v3652_v3  ;;  %v5142_v27 = vadd.f32 %v3488_v23, %v1550_v44 }
 0x1e5   : > { %v3724_v29 = vmax.f32 %v3692_v14, 0.0  ;;  %v3655_v30 = vmul.f32 %v5141_v18, %v6538_v52 }
 0x1e6   : > { %v3723_v31 = vmax.f32 %v3691_v26, 0.0  ;;  %v3654_v32 = vmul.f32 %v5142_v27, %v6538_v52  ;;  %v5100_v34 = vpop.f32.mrb[10].mxu0 }
 0x1e7   : > { %3756 = vst [vmem:[%s6553_s22 + $0x38] sm:$0xff] %v3724_v29  ;;  %v3694_v35 = vadd.f32 %v6543_v56, %v3655_v30  ;;  %v5143_v36 = vadd.f32 %v5100_v34, %v6522_v45  ;;  %v3498_v38 = vpop.f32.mrb[11].mxu0 }
 0x1e8   : > { %3755 = vst [vmem:[%s6553_s22 + $0x30] sm:$0xff] %v3723_v31  ;;  %v3693_v39 = vadd.f32 %v6543_v56, %v3654_v32  ;;  %v5144_v40 = vadd.f32 %v3498_v38, %v6524_v46 }
 0x1e9   : > { %v3726_v41 = vmax.f32 %v3694_v35, 0.0  ;;  %v3657_v42 = vmul.f32 %v5143_v36, %v6538_v52 }
 0x1ea   : > { %v3725_v43 = vmax.f32 %v3693_v39, 0.0  ;;  %v3656_v44 = vmul.f32 %v5144_v40, %v6538_v52  ;;  %v5103_v51 = vpop.f32.mrb[12].mxu0 }
 0x1eb   : > { %3758 = vst [vmem:[%s6553_s22 + $0x48] sm:$0xff] %v3726_v41  ;;  %v3696_v53 = vadd.f32 %v6543_v56, %v3657_v42  ;;  %v5145_v45 = vadd.f32 %v5103_v51, %v6526_v47  ;;  %v3508_v54 = vpop.f32.mrb[13].mxu0 }
 0x1ec   : > { %3757 = vst [vmem:[%s6553_s22 + $0x40] sm:$0xff] %v3725_v43  ;;  %v3695_v58 = vadd.f32 %v6543_v56, %v3656_v44  ;;  %v5146_v46 = vadd.f32 %v3508_v54, %v6528_v48 }
 0x1ed   : > { %v3728_v59 = vmax.f32 %v3696_v53, 0.0  ;;  %v3659_v60 = vmul.f32 %v5145_v45, %v6538_v52 }
 0x1ee   : > { %v3727_v62 = vmax.f32 %v3695_v58, 0.0  ;;  %v3658_v63 = vmul.f32 %v5146_v46, %v6538_v52  ;;  %v5106_v0 = vpop.f32.mrb[14].mxu0 }
 0x1ef   : > { %3760 = vst [vmem:[%s6553_s22 + $0x58] sm:$0xff] %v3728_v59  ;;  %v3698_v2 = vadd.f32 %v6543_v56, %v3659_v60  ;;  %v5147_v4 = vadd.f32 %v5106_v0, %v6530_v49  ;;  %v3518_v47 = vpop.f32.mrb[15].mxu0 }
 0x1f0   : > { %3759 = vst [vmem:[%s6553_s22 + $0x50] sm:$0xff] %v3727_v62  ;;  %v3697_v5 = vadd.f32 %v6543_v56, %v3658_v63  ;;  %v5148_v48 = vadd.f32 %v3518_v47, %v6532_v50 }
 0x1f1   : > { %v3730_v6 = vmax.f32 %v3698_v2, 0.0  ;;  %v3661_v7 = vmul.f32 %v5147_v4, %v6538_v52 }
 0x1f2   : > { %v3729_v9 = vmax.f32 %v3697_v5, 0.0  ;;  %v3660_v10 = vmul.f32 %v5148_v48, %v6538_v52  ;;  %v4909_v55 = vpop.f32.mrb[16].mxu1  ;;  %v5109_v57 = vpop.f32.mrb[16].mxu0 }
 0x1f3   : > { %3762 = vst [vmem:[%s6553_s22 + $0x68] sm:$0xff] %v3730_v6  ;;  %v3700_v28 = vadd.f32 %v6543_v56, %v3661_v7  ;;  %v5149_v49 = vadd.f32 %v5109_v57, %v4909_v55  ;;  %v1977_v24 = vpop.f32.mrb[17].mxu1  ;;  %v3528_v25 = vpop.f32.mrb[17].mxu0 }
 0x1f4   : > { %3761 = vst [vmem:[%s6553_s22 + $0x60] sm:$0xff] %v3729_v9  ;;  %v3699_v8 = vadd.f32 %v6543_v56, %v3660_v10  ;;  %v5150_v50 = vadd.f32 %v3528_v25, %v1977_v24 }
 0x1f5   : > { %v3732_v11 = vmax.f32 %v3700_v28, 0.0  ;;  %v3663_v13 = vmul.f32 %v5149_v49, %v6538_v52 }
 0x1f6   : > { %v3731_v15 = vmax.f32 %v3699_v8, 0.0  ;;  %v3662_v17 = vmul.f32 %v5150_v50, %v6538_v52  ;;  %v4912_v19 = vpop.f32.mrb[18].mxu1  ;;  %v5112_v21 = vpop.f32.mrb[18].mxu0 }
 0x1f7   : > { %3764 = vst [vmem:[%s6553_s22 + $0x78] sm:$0xff] %v3732_v11  ;;  %v3702_v22 = vadd.f32 %v6543_v56, %v3663_v13  ;;  %v5151_v37 = vadd.f32 %v5112_v21, %v4912_v19  ;;  %v1987_v33 = vpop.f32.mrb[19].mxu1  ;;  %v3538_v12 = vpop.f32.mrb[19].mxu0 }
 0x1f8   : > { %3763 = vst [vmem:[%s6553_s22 + $0x70] sm:$0xff] %v3731_v15  ;;  %v3701_v16 = vadd.f32 %v6543_v56, %v3662_v17  ;;  %v5152_v20 = vadd.f32 %v3538_v12, %v1987_v33 }
 0x1f9   : > { %v3734_v1 = vmax.f32 %v3702_v22, 0.0  ;;  %v3665_v3 = vmul.f32 %v5151_v37, %v6538_v52 }
 0x1fa   : > { %v3733_v61 = vmax.f32 %v3701_v16, 0.0  ;;  %v3664_v14 = vmul.f32 %v5152_v20, %v6538_v52  ;;  %v4915_v18 = vpop.f32.mrb[20].mxu1  ;;  %v5115_v23 = vpop.f32.mrb[20].mxu0 }
 0x1fb   : > { %3766 = vst [vmem:[%s6553_s22 + $0x88] sm:$0xff] %v3734_v1  ;;  %v3704_v26 = vadd.f32 %v6543_v56, %v3665_v3  ;;  %v5153_v27 = vadd.f32 %v5115_v23, %v4915_v18  ;;  %v1997_v29 = vpop.f32.mrb[21].mxu1  ;;  %v3548_v30 = vpop.f32.mrb[21].mxu0 }
 0x1fc   : > { %3765 = vst [vmem:[%s6553_s22 + $0x80] sm:$0xff] %v3733_v61  ;;  %v3703_v31 = vadd.f32 %v6543_v56, %v3664_v14  ;;  %v5154_v32 = vadd.f32 %v3548_v30, %v1997_v29 }
 0x1fd   : > { %v3736_v34 = vmax.f32 %v3704_v26, 0.0  ;;  %v3667_v35 = vmul.f32 %v5153_v27, %v6538_v52 }
 0x1fe   : > { %v3735_v36 = vmax.f32 %v3703_v31, 0.0  ;;  %v3666_v38 = vmul.f32 %v5154_v32, %v6538_v52  ;;  %v4918_v39 = vpop.f32.mrb[22].mxu1  ;;  %v5118_v40 = vpop.f32.mrb[22].mxu0 }
 0x1ff   : > { %3768 = vst [vmem:[%s6553_s22 + $0x98] sm:$0xff] %v3736_v34  ;;  %v3706_v41 = vadd.f32 %v6543_v56, %v3667_v35  ;;  %v5155_v42 = vadd.f32 %v5118_v40, %v4918_v39  ;;  %v2007_v43 = vpop.f32.mrb[23].mxu1  ;;  %v3558_v44 = vpop.f32.mrb[23].mxu0 }
 0x200   : > { %3767 = vst [vmem:[%s6553_s22 + $0x90] sm:$0xff] %v3735_v36  ;;  %v3705_v51 = vadd.f32 %v6543_v56, %v3666_v38  ;;  %v5156_v53 = vadd.f32 %v3558_v44, %v2007_v43 }
 0x201   : > { %v3738_v45 = vmax.f32 %v3706_v41, 0.0  ;;  %v3669_v54 = vmul.f32 %v5155_v42, %v6538_v52 }
 0x202   : > { %v3737_v58 = vmax.f32 %v3705_v51, 0.0  ;;  %v3668_v46 = vmul.f32 %v5156_v53, %v6538_v52  ;;  %v4921_v59 = vpop.f32.mrb[24].mxu1  ;;  %v5121_v60 = vpop.f32.mrb[24].mxu0 }
 0x203   : > { %3770 = vst [vmem:[%s6553_s22 + $0xa8] sm:$0xff] %v3738_v45  ;;  %v3708_v62 = vadd.f32 %v6543_v56, %v3669_v54  ;;  %v5157_v63 = vadd.f32 %v5121_v60, %v4921_v59  ;;  %v2017_v0 = vpop.f32.mrb[25].mxu1  ;;  %v3568_v2 = vpop.f32.mrb[25].mxu0 }
 0x204   : > { %3769 = vst [vmem:[%s6553_s22 + $0xa0] sm:$0xff] %v3737_v58  ;;  %v3707_v4 = vadd.f32 %v6543_v56, %v3668_v46  ;;  %v5158_v47 = vadd.f32 %v3568_v2, %v2017_v0 }
 0x205   : > { %v3740_v5 = vmax.f32 %v3708_v62, 0.0  ;;  %v3671_v48 = vmul.f32 %v5157_v63, %v6538_v52 }
 0x206   : > { %v3739_v6 = vmax.f32 %v3707_v4, 0.0  ;;  %v3670_v7 = vmul.f32 %v5158_v47, %v6538_v52  ;;  %v4924_v9 = vpop.f32.mrb[26].mxu1  ;;  %v5124_v10 = vpop.f32.mrb[26].mxu0 }
 0x207   : > { %3772 = vst [vmem:[%s6553_s22 + $0xb8] sm:$0xff] %v3740_v5  ;;  %v3710_v55 = vadd.f32 %v6543_v56, %v3671_v48  ;;  %v5159_v57 = vadd.f32 %v5124_v10, %v4924_v9  ;;  %v2027_v28 = vpop.f32.mrb[27].mxu1  ;;  %v3578_v49 = vpop.f32.mrb[27].mxu0 }
 0x208   : > { %3771 = vst [vmem:[%s6553_s22 + $0xb0] sm:$0xff] %v3739_v6  ;;  %v3709_v24 = vadd.f32 %v6543_v56, %v3670_v7  ;;  %v5160_v25 = vadd.f32 %v3578_v49, %v2027_v28 }
 0x209   : > { %v3742_v8 = vmax.f32 %v3710_v55, 0.0  ;;  %v3673_v50 = vmul.f32 %v5159_v57, %v6538_v52 }
 0x20a   : > { %v3741_v11 = vmax.f32 %v3709_v24, 0.0  ;;  %v3672_v13 = vmul.f32 %v5160_v25, %v6538_v52  ;;  %v4927_v15 = vpop.f32.mrb[28].mxu1  ;;  %v5127_v17 = vpop.f32.mrb[28].mxu0 }
 0x20b   : > { %3774 = vst [vmem:[%s6553_s22 + $0xc8] sm:$0xff] %v3742_v8  ;;  %v3712_v19 = vadd.f32 %v6543_v56, %v3673_v50  ;;  %v5161_v21 = vadd.f32 %v5127_v17, %v4927_v15  ;;  %v2037_v22 = vpop.f32.mrb[29].mxu1  ;;  %v3588_v37 = vpop.f32.mrb[29].mxu0 }
 0x20c   : > { %3773 = vst [vmem:[%s6553_s22 + $0xc0] sm:$0xff] %v3741_v11  ;;  %v3711_v33 = vadd.f32 %v6543_v56, %v3672_v13  ;;  %v5162_v12 = vadd.f32 %v3588_v37, %v2037_v22 }
 0x20d   : > { %v3744_v16 = vmax.f32 %v3712_v19, 0.0  ;;  %v3675_v20 = vmul.f32 %v5161_v21, %v6538_v52 }
 0x20e   : > { %v3743_v1 = vmax.f32 %v3711_v33, 0.0  ;;  %v3674_v3 = vmul.f32 %v5162_v12, %v6538_v52  ;;  %v4930_v61 = vpop.f32.mrb[30].mxu1  ;;  %v5130_v14 = vpop.f32.mrb[30].mxu0 }
 0x20f   : > { %3776 = vst [vmem:[%s6553_s22 + $0xd8] sm:$0xff] %v3744_v16  ;;  %v3714_v18 = vadd.f32 %v6543_v56, %v3675_v20  ;;  %v5163_v23 = vadd.f32 %v5130_v14, %v4930_v61  ;;  %v2047_v26 = vpop.f32.mrb[31].mxu1  ;;  %v3598_v27 = vpop.f32.mrb[31].mxu0 }
 0x210   : > { %3775 = vst [vmem:[%s6553_s22 + $0xd0] sm:$0xff] %v3743_v1  ;;  %v3713_v29 = vadd.f32 %v6543_v56, %v3674_v3  ;;  %v5164_v30 = vadd.f32 %v3598_v27, %v2047_v26 }
 0x211   : > { %v3746_v31 = vmax.f32 %v3714_v18, 0.0  ;;  %v3677_v32 = vmul.f32 %v5163_v23, %v6538_v52 }
 0x212   : > { %v3745_v34 = vmax.f32 %v3713_v29, 0.0  ;;  %v3676_v35 = vmul.f32 %v5164_v30, %v6538_v52 }
 0x213   : > { %3778 = vst [vmem:[%s6553_s22 + $0xe8] sm:$0xff] %v3746_v31  ;;  %v3716_v36 = vadd.f32 %v6543_v56, %v3677_v32 }
 0x214   : > { %3777 = vst [vmem:[%s6553_s22 + $0xe0] sm:$0xff] %v3745_v34  ;;  %v3715_v38 = vadd.f32 %v6543_v56, %v3676_v35 }
 0x215   : > { %v3748_v39 = vmax.f32 %v3716_v36, 0.0 }
 0x216   : > { %v3747_v52 = vmax.f32 %v3715_v38, 0.0 }
 0x217   : > { %3780 = vst [vmem:[%s6553_s22 + $0xf8] sm:$0xff] %v3748_v39 }
 0x218   : > { %3779 = vst [vmem:[%s6553_s22 + $0xf0] sm:$0xff] %v3747_v52 }
 0x219   : > { %5460 = shalt.err (!%p5457_p5)
}
 0x21a   : > { %s5461_s10 = scalar_lea.hbm %s6654_s5, 4096  ;;  %s5465_s13 = scalar_lea.hbm %s6712_s4, 8192 }
 0x21b   : > { %p5462_p6 = scmp.ne.s32.totalorder %s6654_s5, %s5461_s10  ;;  %p5466_p10 = scmp.lt.u32.totalorder %s6654_s5, %s6712_s4 }
 0x21c   : > { %p5467_p11 = scmp.lt.u32.totalorder %s5465_s13, %s5461_s10  ;;  %p5469_p13 = scmp.lt.u32.totalorder %s5461_s10, %s6654_s5 }
 0x21d   : > { %p5463_p7 = pnand %p5462_p6, %p5595_p4 }
 0x21e   : > { %p5468_p12 = por %p5467_p11, %p5466_p10 }
 0x21f   : > { %p5464_p9 = pneg %p5463_p7 }
 0x220   : > { %p5470_p0 = por %p5469_p13, %p5468_p12 }
 0x222   : > { %p5471_p1 = pnand %p5470_p0, %p5464_p9 }
 0x224   : > { %5474 = shalt.err (!%p5471_p1)
}
 0x225   : > { %s5528_s22 = smov 128   ;;  %s5529_s24 = smov 8  }
 0x226   : > { %5390 = dma.vmem_to_hbm [thread:$0]  (%p5595_p4), %s6656_s26, 4096, %s6654_s5, %s6662_s18, %s5528_s22, %s5528_s22, %s5529_s24  }
 0x227 PF: > { %p5396_p2 = scmp.ge.s32.totalorder %s5525_s20, 2  ;;  %s3813_s29 = sand.u32 1, %s5505_s15  }
 0x228   : > { %s3814_s30 = scalar_lea.sflag [#allocation3], %s3813_s29 }
 0x229   : > { %p5393_p3 = pnand %p5396_p2, %p5602_p8 }
 0x22b   : > { %5500 = dma.done.wait (!%p5393_p3), %s3814_s30, 4096  }
 0x22c   : > { %5502 = vsyncadd (!%p5393_p3), %s3814_s30, 4294963200  ;;  %s17_s20 = sadd.s32 1, %s5525_s20   ;;  %s6824_s15 = smov %s5509_s16 }
 0x22d   : > { %p14_p5 = scmp.ge.s32.totalorder %s17_s20, 4   ;;  %s6825_s16 = smov %s5513_s17 }
 0x22e   : > { %s6826_s17 = smov %s5608_s28  ;;  %s6827_s18 = smov %s5521_s19 }
 0x22f   : > { %s6828_s19 = smov %s6830_s23  ;;  %16 = sbr.rel (!%p14_p5) target bundleno = 4 (0x4), region = 82 }
 0x236   :  { %3819 = vsyncpa [#allocation3], 1 }
 0x237   :  { %3821 = vsyncpa [#allocation3 + $0x1], 1 }

</bundles_post_ra>
